<compile_context>
chip_gen: v6e
topology: v6e:2x2x1
jax: 0.10.0
libtpu: 0.0.40
codegen_flags: <defaults>
</compile_context>

<pallas_src>
import numpy as np
import jax
import jax.numpy as jnp
from jax.experimental import pallas as pl
from jax.experimental.pallas import tpu as pltpu

N_LEVELS = 16          # L
N_FEATURES = 2         # F
LOG2_T = 19            # T = 2**19 hash-table entries per level
TABLE_SIZE = 1 << LOG2_T
BASE_RES = 16
FINEST_RES = 512

_P1 = -1640531535      # int32 bit pattern of 2654435761
_P2 = 805459861
# NOTE: the int32 wrap-around multiply matches the PyTorch int64 spatial hash
# because the (2^19 - 1) mask only keeps bits that agree with the low 32 bits.


def _hash_idx_kernel(x_ref, bmin_ref, bmax_ref, gsz_ref, off_ref, idx_ref, h_sc):
    # x_ref   : (3, 1, BB)  raw (unclamped) points, coordinate on the leading axis
    # bmin/max: (3, 1, 1)   bounding box
    # gsz_ref : (3, L, 1)   per-level voxel size (precomputed in wrapper)
    # off_ref : (L, 1) i32  per-level row offset l * 2^19
    # idx_ref : (8, L, BB)  flat hash-table row indices (out)
    # h_sc    : (6, L, BB)  i32 VMEM scratch with the six per-axis hash bases, so
    #                       the corner loop keeps only ~3 slabs live even at BB=2048
    one = jnp.int32(1)
    p1 = jnp.int32(_P1)
    p2 = jnp.int32(_P2)
    mask = jnp.int32(TABLE_SIZE - 1)

    def grid_coord(d):
        xd = x_ref[d]                                  # (1, BB)
        lo = bmin_ref[d]                               # (1, 1)
        hi = bmax_ref[d]
        g = gsz_ref[d]                                 # (L, 1)
        xc = jnp.minimum(jnp.maximum(xd, lo), hi)      # clamp to bounding box
        # real divide (not reciprocal-mul) so the floor matches the torch reference
        return jnp.floor((xc - lo) / g).astype(jnp.int32)   # (L, BB)

    ix = grid_coord(0)
    h_sc[0] = ix
    h_sc[1] = ix + one
    hy0 = grid_coord(1) * p1
    h_sc[2] = hy0
    h_sc[3] = hy0 + p1          # == (iy+1)*p1 under int32 wraparound (one mul saved)
    hz0 = grid_coord(2) * p2
    h_sc[4] = hz0
    h_sc[5] = hz0 + p2

    off = off_ref[...]                                 # (L, 1) -> lane-broadcasts
    for c in range(8):                                 # corner c = 4*ox + 2*oy + oz
        ox, oy, oz = (c >> 2) & 1, (c >> 1) & 1, c & 1
        idx_ref[c] = ((h_sc[ox] ^ h_sc[2 + oy] ^ h_sc[4 + oz]) & mask) + off


def _interp_kernel(x_ref, bmin_ref, bmax_ref, gsz_ref, e_ref, o_ref, w_sc):
    # x_ref : (3, 1, BB*F)  points, each lane duplicated F times (b-major / f-minor)
    # e_ref : (8, L, BB*F)  gathered corner embeddings (corner axis leading)
    # o_ref : (L, BB*F)     interpolated features (out, lane-dense store)
    # w_sc  : (3, L, BB*F)  VMEM scratch: per-axis trilinear weights
    for d in range(3):
        xd = x_ref[d]                                  # (1, BBF)
        lo = bmin_ref[d]
        hi = bmax_ref[d]
        g = gsz_ref[d]                                 # (L, 1)
        xc = jnp.minimum(jnp.maximum(xd, lo), hi)
        bl = jnp.floor((xc - lo) / g)                  # same floor formula as kernel 1
        vmin = bl * g + lo
        w_sc[d] = (xd - vmin) / g                      # weights use unclamped x (torch)

    # Running accumulator over the 8 corners: one corner slab + small temps live
    # at a time (no 8-slab e load, no 4-slab blend tree -> no vreg-file blowout).
    acc = None
    for c in range(8):                                 # corner c = 4*ox + 2*oy + oz
        ox, oy, oz = (c >> 2) & 1, (c >> 1) & 1, c & 1
        sx = w_sc[0] if ox else 1.0 - w_sc[0]
        sy = w_sc[1] if oy else 1.0 - w_sc[1]
        sz = w_sc[2] if oz else 1.0 - w_sc[2]
        term = (sx * sy) * (sz * e_ref[c])
        acc = term if acc is None else acc + term
    o_ref[...] = acc


def _pick_block(B, candidates):
    # Prefer the largest block that divides B while leaving >= 2 grid steps so the
    # "parallel" batch axis can shard across v7x's two TensorCores.
    for bb in candidates:
        if B % bb == 0 and B // bb >= 2:
            return bb
    for bb in candidates:
        if B % bb == 0:
            return bb
    # TODO(synk): pad + mask path for batch sizes that are not multiples of 128.
    raise ValueError(f"batch size {B} must be a multiple of 128")


def hash_embed(x, box_min, box_max, resolutions, tables):
    """x: (B,3) f32 points, tables: (L, 2**T, F) f32.  Returns (B, L*F) f32."""
    B = x.shape[0]
    L = resolutions.shape[0]
    F = tables.shape[-1]
    bb_idx = _pick_block(B, (2048, 1024, 512, 256, 128))   # kernel 1 (hash/idx)
    bb_int = _pick_block(B, (512, 256, 128))               # kernel 2 (blend), lanes = bb*F

    # Per-level constants, hoisted out of the kernels.
    span = box_max - box_min                                     # (3,)
    gsz = (span[:, None] / resolutions[None, :])[:, :, None]     # (3, L, 1) voxel size
    bmin = box_min[:, None, None]                                # (3, 1, 1)
    bmax = box_max[:, None, None]
    lvl_off = (jnp.arange(L, dtype=jnp.int32) * TABLE_SIZE)[:, None]   # (L, 1)
    x_cb = x.T[:, None, :]                                       # (3, 1, B)

    idx = pl.pallas_call(
        _hash_idx_kernel,
        out_shape=jax.ShapeDtypeStruct((8, L, B), jnp.int32),
        grid=(B // bb_idx,),
        in_specs=[
            pl.BlockSpec((3, 1, bb_idx), lambda i: (0, 0, i)),   # points
            pl.BlockSpec((3, 1, 1), lambda i: (0, 0, 0)),        # box min
            pl.BlockSpec((3, 1, 1), lambda i: (0, 0, 0)),        # box max
            pl.BlockSpec((3, L, 1), lambda i: (0, 0, 0)),        # voxel sizes
            pl.BlockSpec((L, 1), lambda i: (0, 0)),              # level row offsets
        ],
        out_specs=pl.BlockSpec((8, L, bb_idx), lambda i: (0, 0, i)),
        scratch_shapes=[pltpu.VMEM((6, L, bb_idx), jnp.int32)],
        compiler_params=pltpu.CompilerParams(dimension_semantics=("parallel",)),
    )(x_cb, bmin, bmax, gsz, lvl_off)

    # TODO(synk): the data-dependent row gather from the 2^19-entry tables stays in
    # XLA; a fully fused kernel with the 64 MiB table pinned in VMEM is possible on
    # v5e/v6e (bf16 tables would be needed on v7x) but requires profiling Mosaic's
    # dynamic-gather lowering first.
    gathered = jnp.take(tables.reshape(L * TABLE_SIZE, F), idx, axis=0)  # (8, L, B, F)
    emb = gathered.reshape(8, L, B * F)                # free contiguous merge, F into lanes
    x_rep = jnp.repeat(x_cb, F, axis=-1)               # (3, 1, B*F): 24 B/pt, replaces the
                                                       # old ~576 B/pt weights repeat

    bbf = bb_int * F
    out_lbf = pl.pallas_call(
        _interp_kernel,
        out_shape=jax.ShapeDtypeStruct((L, B * F), jnp.float32),
        grid=(B // bb_int,),
        in_specs=[
            pl.BlockSpec((3, 1, bbf), lambda i: (0, 0, i)),      # lane-duplicated points
            pl.BlockSpec((3, 1, 1), lambda i: (0, 0, 0)),        # box min
            pl.BlockSpec((3, 1, 1), lambda i: (0, 0, 0)),        # box max
            pl.BlockSpec((3, L, 1), lambda i: (0, 0, 0)),        # voxel sizes
            pl.BlockSpec((8, L, bbf), lambda i: (0, 0, i)),      # corner embeddings
        ],
        out_specs=pl.BlockSpec((L, bbf), lambda i: (0, i)),
        scratch_shapes=[pltpu.VMEM((3, L, bbf), jnp.float32)],
        compiler_params=pltpu.CompilerParams(dimension_semantics=("parallel",)),
    )(x_rep, bmin, bmax, gsz, emb)

    # (L, B*F) -> (B, L*F), matching torch.cat(x_embedded_all, dim=-1).  Kept in XLA:
    # a (B, 32)-wide kernel store would be a masked vst (lane-dense out_spec rule).
    return jnp.transpose(out_lbf.reshape(L, B, F), (1, 0, 2)).reshape(B, L * F)


def reference_forward(x, box_min, box_max, resolutions, tables):
    """Pure-JAX port of HashEmbedder.forward (correctness oracle)."""
    offs = jnp.asarray(
        np.array([[i, j, k] for i in (0, 1) for j in (0, 1) for k in (0, 1)], np.int32))
    primes = jnp.array([1, _P1, _P2], jnp.int32)
    mask = jnp.int32((1 << LOG2_T) - 1)
    outs = []
    for l in range(N_LEVELS):
        res = resolutions[l]
        xc = jnp.clip(x, box_min, box_max)
        gsz = (box_max - box_min) / res
        bl = jnp.floor((xc - box_min) / gsz)
        vmin = bl * gsz + box_min
        vmax = vmin + gsz
        w = (x - vmin) / (vmax - vmin)
        coords = bl.astype(jnp.int32)[:, None, :] + offs[None]             # (B, 8, 3)
        h = (coords[..., 0] * primes[0]) ^ (coords[..., 1] * primes[1]) ^ \
            (coords[..., 2] * primes[2])
        idx = h & mask                                                     # (B, 8)
        e = tables[l][idx]                                                 # (B, 8, F)
        wx, wy, wz = w[:, 0:1], w[:, 1:2], w[:, 2:3]
        c00 = e[:, 0] * (1 - wx) + e[:, 4] * wx
        c01 = e[:, 1] * (1 - wx) + e[:, 5] * wx
        c10 = e[:, 2] * (1 - wx) + e[:, 6] * wx
        c11 = e[:, 3] * (1 - wx) + e[:, 7] * wx
        c0 = c00 * (1 - wy) + c10 * wy
        c1 = c01 * (1 - wy) + c11 * wy
        outs.append(c0 * (1 - wz) + c1 * wz)
    return jnp.concatenate(outs, axis=-1)


if __name__ == "__main__":
    key = jax.random.PRNGKey(0)
    k_x, k_tab = jax.random.split(key)

    B = 128
    box_min = jnp.array([-1.0, -1.0, -1.0], jnp.float32)
    box_max = jnp.array([1.0, 1.0, 1.0], jnp.float32)
    x = jax.random.uniform(k_x, (B, 3), jnp.float32, minval=-1.0, maxval=1.0)

    # nn.Embedding weights per level, init uniform(-1e-4, 1e-4)
    tables = jax.random.uniform(k_tab, (N_LEVELS, TABLE_SIZE, N_FEATURES),
                                jnp.float32, minval=-1e-4, maxval=1e-4)

    # resolutions: floor(Nmin * b**l), b = exp((ln Nmax - ln Nmin)/(L-1)), float32 like torch
    b = np.exp((np.log(np.float32(FINEST_RES)) - np.log(np.float32(BASE_RES)))
               / np.float32(N_LEVELS - 1)).astype(np.float32)
    resolutions = jnp.asarray(
        np.floor(np.float32(BASE_RES) * b ** np.arange(N_LEVELS, dtype=np.float32)),
        dtype=jnp.float32)

    out = jax.jit(hash_embed)(x, box_min, box_max, resolutions, tables)
    out = jax.block_until_ready(out)

    ref = reference_forward(x, box_min, box_max, resolutions, tables)
    assert out.shape == (B, N_LEVELS * N_FEATURES), out.shape
    max_err = float(jnp.max(jnp.abs(out - ref)))
    assert jnp.allclose(out, ref, rtol=1e-4, atol=1e-6), max_err
    print("KERNEL_OK")
</pallas_src>

<mosaic_0001>
module attributes {stable_mosaic.version = 11 : i64} {
  func.func @_hash_idx_kernel(%arg0: i32, %arg1: memref<3x1x128xf32, #tpu.memory_space<vmem>>, %arg2: memref<3x1x1xf32, #tpu.memory_space<vmem>>, %arg3: memref<3x1x1xf32, #tpu.memory_space<vmem>>, %arg4: memref<3x16x1xf32, #tpu.memory_space<vmem>>, %arg5: memref<16x1xi32, #tpu.memory_space<vmem>>, %arg6: memref<8x16x128xi32, #tpu.memory_space<vmem>>, %arg7: memref<6x16x128xi32, #tpu.memory_space<vmem>>) attributes {dimension_semantics = [#tpu.dimension_semantics<parallel>], iteration_bounds = array<i64: 1>, scalar_prefetch = 0 : i64, scratch_operands = 1 : i64, tpu.core_type = #tpu.core_type<tc>, window_params = [{transform_indices = @transform_0, window_bounds = array<i64: 3, 1, 128>}, {pipeline_mode = #tpu.pipeline_mode<synchronous>, transform_indices = @transform_1, window_bounds = array<i64: 3, 1, 1>}, {pipeline_mode = #tpu.pipeline_mode<synchronous>, transform_indices = @transform_2, window_bounds = array<i64: 3, 1, 1>}, {pipeline_mode = #tpu.pipeline_mode<synchronous>, transform_indices = @transform_3, window_bounds = array<i64: 3, 16, 1>}, {pipeline_mode = #tpu.pipeline_mode<synchronous>, transform_indices = @transform_4, window_bounds = array<i64: 16, 1>}, {transform_indices = @transform_5, window_bounds = array<i64: 8, 16, 128>}]} {
    %c0 = arith.constant 0 : index
    %c0_0 = arith.constant 0 : index
    %c0_1 = arith.constant 0 : index
    %0 = vector.load %arg1[%c0, %c0_0, %c0_1] : memref<3x1x128xf32, #tpu.memory_space<vmem>>, vector<1x1x128xf32>
    %1 = vector.shape_cast %0 : vector<1x1x128xf32> to vector<1x128xf32>
    %c0_2 = arith.constant 0 : index
    %c0_3 = arith.constant 0 : index
    %c0_4 = arith.constant 0 : index
    %2 = vector.load %arg2[%c0_2, %c0_3, %c0_4] : memref<3x1x1xf32, #tpu.memory_space<vmem>>, vector<1x1x1xf32>
    %3 = vector.shape_cast %2 : vector<1x1x1xf32> to vector<1x1xf32>
    %c0_5 = arith.constant 0 : index
    %c0_6 = arith.constant 0 : index
    %c0_7 = arith.constant 0 : index
    %4 = vector.load %arg3[%c0_5, %c0_6, %c0_7] : memref<3x1x1xf32, #tpu.memory_space<vmem>>, vector<1x1x1xf32>
    %5 = vector.shape_cast %4 : vector<1x1x1xf32> to vector<1x1xf32>
    %c0_8 = arith.constant 0 : index
    %c0_9 = arith.constant 0 : index
    %c0_10 = arith.constant 0 : index
    %6 = vector.load %arg4[%c0_8, %c0_9, %c0_10] : memref<3x16x1xf32, #tpu.memory_space<vmem>>, vector<1x16x1xf32>
    %7 = vector.shape_cast %6 : vector<1x16x1xf32> to vector<16x1xf32>
    %8 = vector.broadcast %3 : vector<1x1xf32> to vector<1x128xf32>
    %9 = arith.maximumf %1, %8 : vector<1x128xf32>
    %10 = vector.broadcast %5 : vector<1x1xf32> to vector<1x128xf32>
    %11 = arith.minimumf %9, %10 : vector<1x128xf32>
    %12 = vector.broadcast %3 : vector<1x1xf32> to vector<1x128xf32>
    %13 = arith.subf %11, %12 : vector<1x128xf32>
    %14 = vector.broadcast %13 : vector<1x128xf32> to vector<16x128xf32>
    %15 = vector.broadcast %7 : vector<16x1xf32> to vector<16x128xf32>
    %16 = arith.divf %14, %15 : vector<16x128xf32>
    %17 = math.floor %16 : vector<16x128xf32>
    %18 = arith.fptosi %17 : vector<16x128xf32> to vector<16x128xi32>
    %c0_11 = arith.constant 0 : index
    %c0_12 = arith.constant 0 : index
    %c0_13 = arith.constant 0 : index
    %19 = vector.load %arg7[%c0_11, %c0_12, %c0_13] : memref<6x16x128xi32, #tpu.memory_space<vmem>>, vector<1x16x128xi32>
    %20 = vector.shape_cast %19 : vector<1x16x128xi32> to vector<16x128xi32>
    %21 = vector.shape_cast %18 : vector<16x128xi32> to vector<1x16x128xi32>
    tpu.vector_store %arg7[%c0_11, %c0_12, %c0_13], %21 {strides = array<i32>} : memref<6x16x128xi32, #tpu.memory_space<vmem>>, vector<1x16x128xi32>,
    %c1_i32 = arith.constant 1 : i32
    %22 = vector.broadcast %c1_i32 : i32 to vector<16x128xi32>
    %23 = arith.addi %18, %22 : vector<16x128xi32>
    %c1 = arith.constant 1 : index
    %c0_14 = arith.constant 0 : index
    %c0_15 = arith.constant 0 : index
    %24 = vector.load %arg7[%c1, %c0_14, %c0_15] : memref<6x16x128xi32, #tpu.memory_space<vmem>>, vector<1x16x128xi32>
    %25 = vector.shape_cast %24 : vector<1x16x128xi32> to vector<16x128xi32>
    %26 = vector.shape_cast %23 : vector<16x128xi32> to vector<1x16x128xi32>
    tpu.vector_store %arg7[%c1, %c0_14, %c0_15], %26 {strides = array<i32>} : memref<6x16x128xi32, #tpu.memory_space<vmem>>, vector<1x16x128xi32>,
    %c1_16 = arith.constant 1 : index
    %c0_17 = arith.constant 0 : index
    %c0_18 = arith.constant 0 : index
    %27 = vector.load %arg1[%c1_16, %c0_17, %c0_18] : memref<3x1x128xf32, #tpu.memory_space<vmem>>, vector<1x1x128xf32>
    %28 = vector.shape_cast %27 : vector<1x1x128xf32> to vector<1x128xf32>
    %c1_19 = arith.constant 1 : index
    %c0_20 = arith.constant 0 : index
    %c0_21 = arith.constant 0 : index
    %29 = vector.load %arg2[%c1_19, %c0_20, %c0_21] : memref<3x1x1xf32, #tpu.memory_space<vmem>>, vector<1x1x1xf32>
    %30 = vector.shape_cast %29 : vector<1x1x1xf32> to vector<1x1xf32>
    %c1_22 = arith.constant 1 : index
    %c0_23 = arith.constant 0 : index
    %c0_24 = arith.constant 0 : index
    %31 = vector.load %arg3[%c1_22, %c0_23, %c0_24] : memref<3x1x1xf32, #tpu.memory_space<vmem>>, vector<1x1x1xf32>
    %32 = vector.shape_cast %31 : vector<1x1x1xf32> to vector<1x1xf32>
    %c1_25 = arith.constant 1 : index
    %c0_26 = arith.constant 0 : index
    %c0_27 = arith.constant 0 : index
    %33 = vector.load %arg4[%c1_25, %c0_26, %c0_27] : memref<3x16x1xf32, #tpu.memory_space<vmem>>, vector<1x16x1xf32>
    %34 = vector.shape_cast %33 : vector<1x16x1xf32> to vector<16x1xf32>
    %35 = vector.broadcast %30 : vector<1x1xf32> to vector<1x128xf32>
    %36 = arith.maximumf %28, %35 : vector<1x128xf32>
    %37 = vector.broadcast %32 : vector<1x1xf32> to vector<1x128xf32>
    %38 = arith.minimumf %36, %37 : vector<1x128xf32>
    %39 = vector.broadcast %30 : vector<1x1xf32> to vector<1x128xf32>
    %40 = arith.subf %38, %39 : vector<1x128xf32>
    %41 = vector.broadcast %40 : vector<1x128xf32> to vector<16x128xf32>
    %42 = vector.broadcast %34 : vector<16x1xf32> to vector<16x128xf32>
    %43 = arith.divf %41, %42 : vector<16x128xf32>
    %44 = math.floor %43 : vector<16x128xf32>
    %45 = arith.fptosi %44 : vector<16x128xf32> to vector<16x128xi32>
    %c-1640531535_i32 = arith.constant -1640531535 : i32
    %46 = vector.broadcast %c-1640531535_i32 : i32 to vector<16x128xi32>
    %47 = arith.muli %45, %46 : vector<16x128xi32>
    %c2 = arith.constant 2 : index
    %c0_28 = arith.constant 0 : index
    %c0_29 = arith.constant 0 : index
    %48 = vector.load %arg7[%c2, %c0_28, %c0_29] : memref<6x16x128xi32, #tpu.memory_space<vmem>>, vector<1x16x128xi32>
    %49 = vector.shape_cast %48 : vector<1x16x128xi32> to vector<16x128xi32>
    %50 = vector.shape_cast %47 : vector<16x128xi32> to vector<1x16x128xi32>
    tpu.vector_store %arg7[%c2, %c0_28, %c0_29], %50 {strides = array<i32>} : memref<6x16x128xi32, #tpu.memory_space<vmem>>, vector<1x16x128xi32>,
    %c-1640531535_i32_30 = arith.constant -1640531535 : i32
    %51 = vector.broadcast %c-1640531535_i32_30 : i32 to vector<16x128xi32>
    %52 = arith.addi %47, %51 : vector<16x128xi32>
    %c3 = arith.constant 3 : index
    %c0_31 = arith.constant 0 : index
    %c0_32 = arith.constant 0 : index
    %53 = vector.load %arg7[%c3, %c0_31, %c0_32] : memref<6x16x128xi32, #tpu.memory_space<vmem>>, vector<1x16x128xi32>
    %54 = vector.shape_cast %53 : vector<1x16x128xi32> to vector<16x128xi32>
    %55 = vector.shape_cast %52 : vector<16x128xi32> to vector<1x16x128xi32>
    tpu.vector_store %arg7[%c3, %c0_31, %c0_32], %55 {strides = array<i32>} : memref<6x16x128xi32, #tpu.memory_space<vmem>>, vector<1x16x128xi32>,
    %c2_33 = arith.constant 2 : index
    %c0_34 = arith.constant 0 : index
    %c0_35 = arith.constant 0 : index
    %56 = vector.load %arg1[%c2_33, %c0_34, %c0_35] : memref<3x1x128xf32, #tpu.memory_space<vmem>>, vector<1x1x128xf32>
    %57 = vector.shape_cast %56 : vector<1x1x128xf32> to vector<1x128xf32>
    %c2_36 = arith.constant 2 : index
    %c0_37 = arith.constant 0 : index
    %c0_38 = arith.constant 0 : index
    %58 = vector.load %arg2[%c2_36, %c0_37, %c0_38] : memref<3x1x1xf32, #tpu.memory_space<vmem>>, vector<1x1x1xf32>
    %59 = vector.shape_cast %58 : vector<1x1x1xf32> to vector<1x1xf32>
    %c2_39 = arith.constant 2 : index
    %c0_40 = arith.constant 0 : index
    %c0_41 = arith.constant 0 : index
    %60 = vector.load %arg3[%c2_39, %c0_40, %c0_41] : memref<3x1x1xf32, #tpu.memory_space<vmem>>, vector<1x1x1xf32>
    %61 = vector.shape_cast %60 : vector<1x1x1xf32> to vector<1x1xf32>
    %c2_42 = arith.constant 2 : index
    %c0_43 = arith.constant 0 : index
    %c0_44 = arith.constant 0 : index
    %62 = vector.load %arg4[%c2_42, %c0_43, %c0_44] : memref<3x16x1xf32, #tpu.memory_space<vmem>>, vector<1x16x1xf32>
    %63 = vector.shape_cast %62 : vector<1x16x1xf32> to vector<16x1xf32>
    %64 = vector.broadcast %59 : vector<1x1xf32> to vector<1x128xf32>
    %65 = arith.maximumf %57, %64 : vector<1x128xf32>
    %66 = vector.broadcast %61 : vector<1x1xf32> to vector<1x128xf32>
    %67 = arith.minimumf %65, %66 : vector<1x128xf32>
    %68 = vector.broadcast %59 : vector<1x1xf32> to vector<1x128xf32>
    %69 = arith.subf %67, %68 : vector<1x128xf32>
    %70 = vector.broadcast %69 : vector<1x128xf32> to vector<16x128xf32>
    %71 = vector.broadcast %63 : vector<16x1xf32> to vector<16x128xf32>
    %72 = arith.divf %70, %71 : vector<16x128xf32>
    %73 = math.floor %72 : vector<16x128xf32>
    %74 = arith.fptosi %73 : vector<16x128xf32> to vector<16x128xi32>
    %c805459861_i32 = arith.constant 805459861 : i32
    %75 = vector.broadcast %c805459861_i32 : i32 to vector<16x128xi32>
    %76 = arith.muli %74, %75 : vector<16x128xi32>
    %c4 = arith.constant 4 : index
    %c0_45 = arith.constant 0 : index
    %c0_46 = arith.constant 0 : index
    %77 = vector.load %arg7[%c4, %c0_45, %c0_46] : memref<6x16x128xi32, #tpu.memory_space<vmem>>, vector<1x16x128xi32>
    %78 = vector.shape_cast %77 : vector<1x16x128xi32> to vector<16x128xi32>
    %79 = vector.shape_cast %76 : vector<16x128xi32> to vector<1x16x128xi32>
    tpu.vector_store %arg7[%c4, %c0_45, %c0_46], %79 {strides = array<i32>} : memref<6x16x128xi32, #tpu.memory_space<vmem>>, vector<1x16x128xi32>,
    %c805459861_i32_47 = arith.constant 805459861 : i32
    %80 = vector.broadcast %c805459861_i32_47 : i32 to vector<16x128xi32>
    %81 = arith.addi %76, %80 : vector<16x128xi32>
    %c5 = arith.constant 5 : index
    %c0_48 = arith.constant 0 : index
    %c0_49 = arith.constant 0 : index
    %82 = vector.load %arg7[%c5, %c0_48, %c0_49] : memref<6x16x128xi32, #tpu.memory_space<vmem>>, vector<1x16x128xi32>
    %83 = vector.shape_cast %82 : vector<1x16x128xi32> to vector<16x128xi32>
    %84 = vector.shape_cast %81 : vector<16x128xi32> to vector<1x16x128xi32>
    tpu.vector_store %arg7[%c5, %c0_48, %c0_49], %84 {strides = array<i32>} : memref<6x16x128xi32, #tpu.memory_space<vmem>>, vector<1x16x128xi32>,
    %c0_50 = arith.constant 0 : index
    %c0_51 = arith.constant 0 : index
    %85 = vector.load %arg5[%c0_50, %c0_51] : memref<16x1xi32, #tpu.memory_space<vmem>>, vector<16x1xi32>
    %c0_52 = arith.constant 0 : index
    %c0_53 = arith.constant 0 : index
    %c0_54 = arith.constant 0 : index
    %86 = vector.load %arg7[%c0_52, %c0_53, %c0_54] : memref<6x16x128xi32, #tpu.memory_space<vmem>>, vector<1x16x128xi32>
    %87 = vector.shape_cast %86 : vector<1x16x128xi32> to vector<16x128xi32>
    %c2_55 = arith.constant 2 : index
    %c0_56 = arith.constant 0 : index
    %c0_57 = arith.constant 0 : index
    %88 = vector.load %arg7[%c2_55, %c0_56, %c0_57] : memref<6x16x128xi32, #tpu.memory_space<vmem>>, vector<1x16x128xi32>
    %89 = vector.shape_cast %88 : vector<1x16x128xi32> to vector<16x128xi32>
    %90 = arith.xori %87, %89 : vector<16x128xi32>
    %c4_58 = arith.constant 4 : index
    %c0_59 = arith.constant 0 : index
    %c0_60 = arith.constant 0 : index
    %91 = vector.load %arg7[%c4_58, %c0_59, %c0_60] : memref<6x16x128xi32, #tpu.memory_space<vmem>>, vector<1x16x128xi32>
    %92 = vector.shape_cast %91 : vector<1x16x128xi32> to vector<16x128xi32>
    %93 = arith.xori %90, %92 : vector<16x128xi32>
    %c524287_i32 = arith.constant 524287 : i32
    %94 = vector.broadcast %c524287_i32 : i32 to vector<16x128xi32>
    %95 = arith.andi %93, %94 : vector<16x128xi32>
    %96 = vector.broadcast %85 : vector<16x1xi32> to vector<16x128xi32>
    %97 = arith.addi %95, %96 : vector<16x128xi32>
    %c0_61 = arith.constant 0 : index
    %c0_62 = arith.constant 0 : index
    %c0_63 = arith.constant 0 : index
    %98 = vector.load %arg6[%c0_61, %c0_62, %c0_63] : memref<8x16x128xi32, #tpu.memory_space<vmem>>, vector<1x16x128xi32>
    %99 = vector.shape_cast %98 : vector<1x16x128xi32> to vector<16x128xi32>
    %100 = vector.shape_cast %97 : vector<16x128xi32> to vector<1x16x128xi32>
    tpu.vector_store %arg6[%c0_61, %c0_62, %c0_63], %100 {strides = array<i32>} : memref<8x16x128xi32, #tpu.memory_space<vmem>>, vector<1x16x128xi32>,
    %c0_64 = arith.constant 0 : index
    %c0_65 = arith.constant 0 : index
    %c0_66 = arith.constant 0 : index
    %101 = vector.load %arg7[%c0_64, %c0_65, %c0_66] : memref<6x16x128xi32, #tpu.memory_space<vmem>>, vector<1x16x128xi32>
    %102 = vector.shape_cast %101 : vector<1x16x128xi32> to vector<16x128xi32>
    %c2_67 = arith.constant 2 : index
    %c0_68 = arith.constant 0 : index
    %c0_69 = arith.constant 0 : index
    %103 = vector.load %arg7[%c2_67, %c0_68, %c0_69] : memref<6x16x128xi32, #tpu.memory_space<vmem>>, vector<1x16x128xi32>
    %104 = vector.shape_cast %103 : vector<1x16x128xi32> to vector<16x128xi32>
    %105 = arith.xori %102, %104 : vector<16x128xi32>
    %c5_70 = arith.constant 5 : index
    %c0_71 = arith.constant 0 : index
    %c0_72 = arith.constant 0 : index
    %106 = vector.load %arg7[%c5_70, %c0_71, %c0_72] : memref<6x16x128xi32, #tpu.memory_space<vmem>>, vector<1x16x128xi32>
    %107 = vector.shape_cast %106 : vector<1x16x128xi32> to vector<16x128xi32>
    %108 = arith.xori %105, %107 : vector<16x128xi32>
    %c524287_i32_73 = arith.constant 524287 : i32
    %109 = vector.broadcast %c524287_i32_73 : i32 to vector<16x128xi32>
    %110 = arith.andi %108, %109 : vector<16x128xi32>
    %111 = vector.broadcast %85 : vector<16x1xi32> to vector<16x128xi32>
    %112 = arith.addi %110, %111 : vector<16x128xi32>
    %c1_74 = arith.constant 1 : index
    %c0_75 = arith.constant 0 : index
    %c0_76 = arith.constant 0 : index
    %113 = vector.load %arg6[%c1_74, %c0_75, %c0_76] : memref<8x16x128xi32, #tpu.memory_space<vmem>>, vector<1x16x128xi32>
    %114 = vector.shape_cast %113 : vector<1x16x128xi32> to vector<16x128xi32>
    %115 = vector.shape_cast %112 : vector<16x128xi32> to vector<1x16x128xi32>
    tpu.vector_store %arg6[%c1_74, %c0_75, %c0_76], %115 {strides = array<i32>} : memref<8x16x128xi32, #tpu.memory_space<vmem>>, vector<1x16x128xi32>,
    %c0_77 = arith.constant 0 : index
    %c0_78 = arith.constant 0 : index
    %c0_79 = arith.constant 0 : index
    %116 = vector.load %arg7[%c0_77, %c0_78, %c0_79] : memref<6x16x128xi32, #tpu.memory_space<vmem>>, vector<1x16x128xi32>
    %117 = vector.shape_cast %116 : vector<1x16x128xi32> to vector<16x128xi32>
    %c3_80 = arith.constant 3 : index
    %c0_81 = arith.constant 0 : index
    %c0_82 = arith.constant 0 : index
    %118 = vector.load %arg7[%c3_80, %c0_81, %c0_82] : memref<6x16x128xi32, #tpu.memory_space<vmem>>, vector<1x16x128xi32>
    %119 = vector.shape_cast %118 : vector<1x16x128xi32> to vector<16x128xi32>
    %120 = arith.xori %117, %119 : vector<16x128xi32>
    %c4_83 = arith.constant 4 : index
    %c0_84 = arith.constant 0 : index
    %c0_85 = arith.constant 0 : index
    %121 = vector.load %arg7[%c4_83, %c0_84, %c0_85] : memref<6x16x128xi32, #tpu.memory_space<vmem>>, vector<1x16x128xi32>
    %122 = vector.shape_cast %121 : vector<1x16x128xi32> to vector<16x128xi32>
    %123 = arith.xori %120, %122 : vector<16x128xi32>
    %c524287_i32_86 = arith.constant 524287 : i32
    %124 = vector.broadcast %c524287_i32_86 : i32 to vector<16x128xi32>
    %125 = arith.andi %123, %124 : vector<16x128xi32>
    %126 = vector.broadcast %85 : vector<16x1xi32> to vector<16x128xi32>
    %127 = arith.addi %125, %126 : vector<16x128xi32>
    %c2_87 = arith.constant 2 : index
    %c0_88 = arith.constant 0 : index
    %c0_89 = arith.constant 0 : index
    %128 = vector.load %arg6[%c2_87, %c0_88, %c0_89] : memref<8x16x128xi32, #tpu.memory_space<vmem>>, vector<1x16x128xi32>
    %129 = vector.shape_cast %128 : vector<1x16x128xi32> to vector<16x128xi32>
    %130 = vector.shape_cast %127 : vector<16x128xi32> to vector<1x16x128xi32>
    tpu.vector_store %arg6[%c2_87, %c0_88, %c0_89], %130 {strides = array<i32>} : memref<8x16x128xi32, #tpu.memory_space<vmem>>, vector<1x16x128xi32>,
    %c0_90 = arith.constant 0 : index
    %c0_91 = arith.constant 0 : index
    %c0_92 = arith.constant 0 : index
    %131 = vector.load %arg7[%c0_90, %c0_91, %c0_92] : memref<6x16x128xi32, #tpu.memory_space<vmem>>, vector<1x16x128xi32>
    %132 = vector.shape_cast %131 : vector<1x16x128xi32> to vector<16x128xi32>
    %c3_93 = arith.constant 3 : index
    %c0_94 = arith.constant 0 : index
    %c0_95 = arith.constant 0 : index
    %133 = vector.load %arg7[%c3_93, %c0_94, %c0_95] : memref<6x16x128xi32, #tpu.memory_space<vmem>>, vector<1x16x128xi32>
    %134 = vector.shape_cast %133 : vector<1x16x128xi32> to vector<16x128xi32>
    %135 = arith.xori %132, %134 : vector<16x128xi32>
    %c5_96 = arith.constant 5 : index
    %c0_97 = arith.constant 0 : index
    %c0_98 = arith.constant 0 : index
    %136 = vector.load %arg7[%c5_96, %c0_97, %c0_98] : memref<6x16x128xi32, #tpu.memory_space<vmem>>, vector<1x16x128xi32>
    %137 = vector.shape_cast %136 : vector<1x16x128xi32> to vector<16x128xi32>
    %138 = arith.xori %135, %137 : vector<16x128xi32>
    %c524287_i32_99 = arith.constant 524287 : i32
    %139 = vector.broadcast %c524287_i32_99 : i32 to vector<16x128xi32>
    %140 = arith.andi %138, %139 : vector<16x128xi32>
    %141 = vector.broadcast %85 : vector<16x1xi32> to vector<16x128xi32>
    %142 = arith.addi %140, %141 : vector<16x128xi32>
    %c3_100 = arith.constant 3 : index
    %c0_101 = arith.constant 0 : index
    %c0_102 = arith.constant 0 : index
    %143 = vector.load %arg6[%c3_100, %c0_101, %c0_102] : memref<8x16x128xi32, #tpu.memory_space<vmem>>, vector<1x16x128xi32>
    %144 = vector.shape_cast %143 : vector<1x16x128xi32> to vector<16x128xi32>
    %145 = vector.shape_cast %142 : vector<16x128xi32> to vector<1x16x128xi32>
    tpu.vector_store %arg6[%c3_100, %c0_101, %c0_102], %145 {strides = array<i32>} : memref<8x16x128xi32, #tpu.memory_space<vmem>>, vector<1x16x128xi32>,
    %c1_103 = arith.constant 1 : index
    %c0_104 = arith.constant 0 : index
    %c0_105 = arith.constant 0 : index
    %146 = vector.load %arg7[%c1_103, %c0_104, %c0_105] : memref<6x16x128xi32, #tpu.memory_space<vmem>>, vector<1x16x128xi32>
    %147 = vector.shape_cast %146 : vector<1x16x128xi32> to vector<16x128xi32>
    %c2_106 = arith.constant 2 : index
    %c0_107 = arith.constant 0 : index
    %c0_108 = arith.constant 0 : index
    %148 = vector.load %arg7[%c2_106, %c0_107, %c0_108] : memref<6x16x128xi32, #tpu.memory_space<vmem>>, vector<1x16x128xi32>
    %149 = vector.shape_cast %148 : vector<1x16x128xi32> to vector<16x128xi32>
    %150 = arith.xori %147, %149 : vector<16x128xi32>
    %c4_109 = arith.constant 4 : index
    %c0_110 = arith.constant 0 : index
    %c0_111 = arith.constant 0 : index
    %151 = vector.load %arg7[%c4_109, %c0_110, %c0_111] : memref<6x16x128xi32, #tpu.memory_space<vmem>>, vector<1x16x128xi32>
    %152 = vector.shape_cast %151 : vector<1x16x128xi32> to vector<16x128xi32>
    %153 = arith.xori %150, %152 : vector<16x128xi32>
    %c524287_i32_112 = arith.constant 524287 : i32
    %154 = vector.broadcast %c524287_i32_112 : i32 to vector<16x128xi32>
    %155 = arith.andi %153, %154 : vector<16x128xi32>
    %156 = vector.broadcast %85 : vector<16x1xi32> to vector<16x128xi32>
    %157 = arith.addi %155, %156 : vector<16x128xi32>
    %c4_113 = arith.constant 4 : index
    %c0_114 = arith.constant 0 : index
    %c0_115 = arith.constant 0 : index
    %158 = vector.load %arg6[%c4_113, %c0_114, %c0_115] : memref<8x16x128xi32, #tpu.memory_space<vmem>>, vector<1x16x128xi32>
    %159 = vector.shape_cast %158 : vector<1x16x128xi32> to vector<16x128xi32>
    %160 = vector.shape_cast %157 : vector<16x128xi32> to vector<1x16x128xi32>
    tpu.vector_store %arg6[%c4_113, %c0_114, %c0_115], %160 {strides = array<i32>} : memref<8x16x128xi32, #tpu.memory_space<vmem>>, vector<1x16x128xi32>,
    %c1_116 = arith.constant 1 : index
    %c0_117 = arith.constant 0 : index
    %c0_118 = arith.constant 0 : index
    %161 = vector.load %arg7[%c1_116, %c0_117, %c0_118] : memref<6x16x128xi32, #tpu.memory_space<vmem>>, vector<1x16x128xi32>
    %162 = vector.shape_cast %161 : vector<1x16x128xi32> to vector<16x128xi32>
    %c2_119 = arith.constant 2 : index
    %c0_120 = arith.constant 0 : index
    %c0_121 = arith.constant 0 : index
    %163 = vector.load %arg7[%c2_119, %c0_120, %c0_121] : memref<6x16x128xi32, #tpu.memory_space<vmem>>, vector<1x16x128xi32>
    %164 = vector.shape_cast %163 : vector<1x16x128xi32> to vector<16x128xi32>
    %165 = arith.xori %162, %164 : vector<16x128xi32>
    %c5_122 = arith.constant 5 : index
    %c0_123 = arith.constant 0 : index
    %c0_124 = arith.constant 0 : index
    %166 = vector.load %arg7[%c5_122, %c0_123, %c0_124] : memref<6x16x128xi32, #tpu.memory_space<vmem>>, vector<1x16x128xi32>
    %167 = vector.shape_cast %166 : vector<1x16x128xi32> to vector<16x128xi32>
    %168 = arith.xori %165, %167 : vector<16x128xi32>
    %c524287_i32_125 = arith.constant 524287 : i32
    %169 = vector.broadcast %c524287_i32_125 : i32 to vector<16x128xi32>
    %170 = arith.andi %168, %169 : vector<16x128xi32>
    %171 = vector.broadcast %85 : vector<16x1xi32> to vector<16x128xi32>
    %172 = arith.addi %170, %171 : vector<16x128xi32>
    %c5_126 = arith.constant 5 : index
    %c0_127 = arith.constant 0 : index
    %c0_128 = arith.constant 0 : index
    %173 = vector.load %arg6[%c5_126, %c0_127, %c0_128] : memref<8x16x128xi32, #tpu.memory_space<vmem>>, vector<1x16x128xi32>
    %174 = vector.shape_cast %173 : vector<1x16x128xi32> to vector<16x128xi32>
    %175 = vector.shape_cast %172 : vector<16x128xi32> to vector<1x16x128xi32>
    tpu.vector_store %arg6[%c5_126, %c0_127, %c0_128], %175 {strides = array<i32>} : memref<8x16x128xi32, #tpu.memory_space<vmem>>, vector<1x16x128xi32>,
    %c1_129 = arith.constant 1 : index
    %c0_130 = arith.constant 0 : index
    %c0_131 = arith.constant 0 : index
    %176 = vector.load %arg7[%c1_129, %c0_130, %c0_131] : memref<6x16x128xi32, #tpu.memory_space<vmem>>, vector<1x16x128xi32>
    %177 = vector.shape_cast %176 : vector<1x16x128xi32> to vector<16x128xi32>
    %c3_132 = arith.constant 3 : index
    %c0_133 = arith.constant 0 : index
    %c0_134 = arith.constant 0 : index
    %178 = vector.load %arg7[%c3_132, %c0_133, %c0_134] : memref<6x16x128xi32, #tpu.memory_space<vmem>>, vector<1x16x128xi32>
    %179 = vector.shape_cast %178 : vector<1x16x128xi32> to vector<16x128xi32>
    %180 = arith.xori %177, %179 : vector<16x128xi32>
    %c4_135 = arith.constant 4 : index
    %c0_136 = arith.constant 0 : index
    %c0_137 = arith.constant 0 : index
    %181 = vector.load %arg7[%c4_135, %c0_136, %c0_137] : memref<6x16x128xi32, #tpu.memory_space<vmem>>, vector<1x16x128xi32>
    %182 = vector.shape_cast %181 : vector<1x16x128xi32> to vector<16x128xi32>
    %183 = arith.xori %180, %182 : vector<16x128xi32>
    %c524287_i32_138 = arith.constant 524287 : i32
    %184 = vector.broadcast %c524287_i32_138 : i32 to vector<16x128xi32>
    %185 = arith.andi %183, %184 : vector<16x128xi32>
    %186 = vector.broadcast %85 : vector<16x1xi32> to vector<16x128xi32>
    %187 = arith.addi %185, %186 : vector<16x128xi32>
    %c6 = arith.constant 6 : index
    %c0_139 = arith.constant 0 : index
    %c0_140 = arith.constant 0 : index
    %188 = vector.load %arg6[%c6, %c0_139, %c0_140] : memref<8x16x128xi32, #tpu.memory_space<vmem>>, vector<1x16x128xi32>
    %189 = vector.shape_cast %188 : vector<1x16x128xi32> to vector<16x128xi32>
    %190 = vector.shape_cast %187 : vector<16x128xi32> to vector<1x16x128xi32>
    tpu.vector_store %arg6[%c6, %c0_139, %c0_140], %190 {strides = array<i32>} : memref<8x16x128xi32, #tpu.memory_space<vmem>>, vector<1x16x128xi32>,
    %c1_141 = arith.constant 1 : index
    %c0_142 = arith.constant 0 : index
    %c0_143 = arith.constant 0 : index
    %191 = vector.load %arg7[%c1_141, %c0_142, %c0_143] : memref<6x16x128xi32, #tpu.memory_space<vmem>>, vector<1x16x128xi32>
    %192 = vector.shape_cast %191 : vector<1x16x128xi32> to vector<16x128xi32>
    %c3_144 = arith.constant 3 : index
    %c0_145 = arith.constant 0 : index
    %c0_146 = arith.constant 0 : index
    %193 = vector.load %arg7[%c3_144, %c0_145, %c0_146] : memref<6x16x128xi32, #tpu.memory_space<vmem>>, vector<1x16x128xi32>
    %194 = vector.shape_cast %193 : vector<1x16x128xi32> to vector<16x128xi32>
    %195 = arith.xori %192, %194 : vector<16x128xi32>
    %c5_147 = arith.constant 5 : index
    %c0_148 = arith.constant 0 : index
    %c0_149 = arith.constant 0 : index
    %196 = vector.load %arg7[%c5_147, %c0_148, %c0_149] : memref<6x16x128xi32, #tpu.memory_space<vmem>>, vector<1x16x128xi32>
    %197 = vector.shape_cast %196 : vector<1x16x128xi32> to vector<16x128xi32>
    %198 = arith.xori %195, %197 : vector<16x128xi32>
    %c524287_i32_150 = arith.constant 524287 : i32
    %199 = vector.broadcast %c524287_i32_150 : i32 to vector<16x128xi32>
    %200 = arith.andi %198, %199 : vector<16x128xi32>
    %201 = vector.broadcast %85 : vector<16x1xi32> to vector<16x128xi32>
    %202 = arith.addi %200, %201 : vector<16x128xi32>
    %c7 = arith.constant 7 : index
    %c0_151 = arith.constant 0 : index
    %c0_152 = arith.constant 0 : index
    %203 = vector.load %arg6[%c7, %c0_151, %c0_152] : memref<8x16x128xi32, #tpu.memory_space<vmem>>, vector<1x16x128xi32>
    %204 = vector.shape_cast %203 : vector<1x16x128xi32> to vector<16x128xi32>
    %205 = vector.shape_cast %202 : vector<16x128xi32> to vector<1x16x128xi32>
    tpu.vector_store %arg6[%c7, %c0_151, %c0_152], %205 {strides = array<i32>} : memref<8x16x128xi32, #tpu.memory_space<vmem>>, vector<1x16x128xi32>,
    return
  }
  func.func @transform_0(%arg0: i32) -> (i32, i32, i32) {
    %c0_i32 = arith.constant 0 : i32
    %c0_i32_0 = arith.constant 0 : i32
    %c0_i32_1 = arith.constant 0 : i32
    return %c0_i32, %c0_i32_0, %arg0 : i32, i32, i32
  }
  func.func @transform_1(%arg0: i32) -> (i32, i32, i32) {
    %c0_i32 = arith.constant 0 : i32
    %c0_i32_0 = arith.constant 0 : i32
    %c0_i32_1 = arith.constant 0 : i32
    %c0_i32_2 = arith.constant 0 : i32
    return %c0_i32, %c0_i32_0, %c0_i32_1 : i32, i32, i32
  }
  func.func @transform_2(%arg0: i32) -> (i32, i32, i32) {
    %c0_i32 = arith.constant 0 : i32
    %c0_i32_0 = arith.constant 0 : i32
    %c0_i32_1 = arith.constant 0 : i32
    %c0_i32_2 = arith.constant 0 : i32
    return %c0_i32, %c0_i32_0, %c0_i32_1 : i32, i32, i32
  }
  func.func @transform_3(%arg0: i32) -> (i32, i32, i32) {
    %c0_i32 = arith.constant 0 : i32
    %c0_i32_0 = arith.constant 0 : i32
    %c0_i32_1 = arith.constant 0 : i32
    %c0_i32_2 = arith.constant 0 : i32
    return %c0_i32, %c0_i32_0, %c0_i32_1 : i32, i32, i32
  }
  func.func @transform_4(%arg0: i32) -> (i32, i32) {
    %c0_i32 = arith.constant 0 : i32
    %c0_i32_0 = arith.constant 0 : i32
    %c0_i32_1 = arith.constant 0 : i32
    return %c0_i32, %c0_i32_0 : i32, i32
  }
  func.func @transform_5(%arg0: i32) -> (i32, i32, i32) {
    %c0_i32 = arith.constant 0 : i32
    %c0_i32_0 = arith.constant 0 : i32
    %c0_i32_1 = arith.constant 0 : i32
    return %c0_i32, %c0_i32_0, %arg0 : i32, i32, i32
  }
}

module attributes {stable_mosaic.version = 11 : i64} {
  func.func @_interp_kernel(%arg0: i32, %arg1: memref<3x1x256xf32, #tpu.memory_space<vmem>>, %arg2: memref<3x1x1xf32, #tpu.memory_space<vmem>>, %arg3: memref<3x1x1xf32, #tpu.memory_space<vmem>>, %arg4: memref<3x16x1xf32, #tpu.memory_space<vmem>>, %arg5: memref<8x16x256xf32, #tpu.memory_space<vmem>>, %arg6: memref<16x256xf32, #tpu.memory_space<vmem>>, %arg7: memref<3x16x256xf32, #tpu.memory_space<vmem>>) attributes {dimension_semantics = [#tpu.dimension_semantics<parallel>], iteration_bounds = array<i64: 1>, scalar_prefetch = 0 : i64, scratch_operands = 1 : i64, tpu.core_type = #tpu.core_type<tc>, window_params = [{transform_indices = @transform_0, window_bounds = array<i64: 3, 1, 256>}, {pipeline_mode = #tpu.pipeline_mode<synchronous>, transform_indices = @transform_1, window_bounds = array<i64: 3, 1, 1>}, {pipeline_mode = #tpu.pipeline_mode<synchronous>, transform_indices = @transform_2, window_bounds = array<i64: 3, 1, 1>}, {pipeline_mode = #tpu.pipeline_mode<synchronous>, transform_indices = @transform_3, window_bounds = array<i64: 3, 16, 1>}, {transform_indices = @transform_4, window_bounds = array<i64: 8, 16, 256>}, {transform_indices = @transform_5, window_bounds = array<i64: 16, 256>}]} {
    %c0 = arith.constant 0 : index
    %c0_0 = arith.constant 0 : index
    %c0_1 = arith.constant 0 : index
    %0 = vector.load %arg1[%c0, %c0_0, %c0_1] : memref<3x1x256xf32, #tpu.memory_space<vmem>>, vector<1x1x256xf32>
    %1 = vector.shape_cast %0 : vector<1x1x256xf32> to vector<1x256xf32>
    %c0_2 = arith.constant 0 : index
    %c0_3 = arith.constant 0 : index
    %c0_4 = arith.constant 0 : index
    %2 = vector.load %arg2[%c0_2, %c0_3, %c0_4] : memref<3x1x1xf32, #tpu.memory_space<vmem>>, vector<1x1x1xf32>
    %3 = vector.shape_cast %2 : vector<1x1x1xf32> to vector<1x1xf32>
    %c0_5 = arith.constant 0 : index
    %c0_6 = arith.constant 0 : index
    %c0_7 = arith.constant 0 : index
    %4 = vector.load %arg3[%c0_5, %c0_6, %c0_7] : memref<3x1x1xf32, #tpu.memory_space<vmem>>, vector<1x1x1xf32>
    %5 = vector.shape_cast %4 : vector<1x1x1xf32> to vector<1x1xf32>
    %c0_8 = arith.constant 0 : index
    %c0_9 = arith.constant 0 : index
    %c0_10 = arith.constant 0 : index
    %6 = vector.load %arg4[%c0_8, %c0_9, %c0_10] : memref<3x16x1xf32, #tpu.memory_space<vmem>>, vector<1x16x1xf32>
    %7 = vector.shape_cast %6 : vector<1x16x1xf32> to vector<16x1xf32>
    %8 = vector.broadcast %3 : vector<1x1xf32> to vector<1x256xf32>
    %9 = arith.maximumf %1, %8 : vector<1x256xf32>
    %10 = vector.broadcast %5 : vector<1x1xf32> to vector<1x256xf32>
    %11 = arith.minimumf %9, %10 : vector<1x256xf32>
    %12 = vector.broadcast %3 : vector<1x1xf32> to vector<1x256xf32>
    %13 = arith.subf %11, %12 : vector<1x256xf32>
    %14 = vector.broadcast %13 : vector<1x256xf32> to vector<16x256xf32>
    %15 = vector.broadcast %7 : vector<16x1xf32> to vector<16x256xf32>
    %16 = arith.divf %14, %15 : vector<16x256xf32>
    %17 = math.floor %16 : vector<16x256xf32>
    %18 = vector.broadcast %7 : vector<16x1xf32> to vector<16x256xf32>
    %19 = arith.mulf %17, %18 : vector<16x256xf32>
    %20 = vector.broadcast %3 : vector<1x1xf32> to vector<16x256xf32>
    %21 = arith.addf %19, %20 : vector<16x256xf32>
    %22 = vector.broadcast %1 : vector<1x256xf32> to vector<16x256xf32>
    %23 = arith.subf %22, %21 : vector<16x256xf32>
    %24 = vector.broadcast %7 : vector<16x1xf32> to vector<16x256xf32>
    %25 = arith.divf %23, %24 : vector<16x256xf32>
    %c0_11 = arith.constant 0 : index
    %c0_12 = arith.constant 0 : index
    %c0_13 = arith.constant 0 : index
    %26 = vector.load %arg7[%c0_11, %c0_12, %c0_13] : memref<3x16x256xf32, #tpu.memory_space<vmem>>, vector<1x16x256xf32>
    %27 = vector.shape_cast %26 : vector<1x16x256xf32> to vector<16x256xf32>
    %28 = vector.shape_cast %25 : vector<16x256xf32> to vector<1x16x256xf32>
    tpu.vector_store %arg7[%c0_11, %c0_12, %c0_13], %28 {strides = array<i32>} : memref<3x16x256xf32, #tpu.memory_space<vmem>>, vector<1x16x256xf32>,
    %c1 = arith.constant 1 : index
    %c0_14 = arith.constant 0 : index
    %c0_15 = arith.constant 0 : index
    %29 = vector.load %arg1[%c1, %c0_14, %c0_15] : memref<3x1x256xf32, #tpu.memory_space<vmem>>, vector<1x1x256xf32>
    %30 = vector.shape_cast %29 : vector<1x1x256xf32> to vector<1x256xf32>
    %c1_16 = arith.constant 1 : index
    %c0_17 = arith.constant 0 : index
    %c0_18 = arith.constant 0 : index
    %31 = vector.load %arg2[%c1_16, %c0_17, %c0_18] : memref<3x1x1xf32, #tpu.memory_space<vmem>>, vector<1x1x1xf32>
    %32 = vector.shape_cast %31 : vector<1x1x1xf32> to vector<1x1xf32>
    %c1_19 = arith.constant 1 : index
    %c0_20 = arith.constant 0 : index
    %c0_21 = arith.constant 0 : index
    %33 = vector.load %arg3[%c1_19, %c0_20, %c0_21] : memref<3x1x1xf32, #tpu.memory_space<vmem>>, vector<1x1x1xf32>
    %34 = vector.shape_cast %33 : vector<1x1x1xf32> to vector<1x1xf32>
    %c1_22 = arith.constant 1 : index
    %c0_23 = arith.constant 0 : index
    %c0_24 = arith.constant 0 : index
    %35 = vector.load %arg4[%c1_22, %c0_23, %c0_24] : memref<3x16x1xf32, #tpu.memory_space<vmem>>, vector<1x16x1xf32>
    %36 = vector.shape_cast %35 : vector<1x16x1xf32> to vector<16x1xf32>
    %37 = vector.broadcast %32 : vector<1x1xf32> to vector<1x256xf32>
    %38 = arith.maximumf %30, %37 : vector<1x256xf32>
    %39 = vector.broadcast %34 : vector<1x1xf32> to vector<1x256xf32>
    %40 = arith.minimumf %38, %39 : vector<1x256xf32>
    %41 = vector.broadcast %32 : vector<1x1xf32> to vector<1x256xf32>
    %42 = arith.subf %40, %41 : vector<1x256xf32>
    %43 = vector.broadcast %42 : vector<1x256xf32> to vector<16x256xf32>
    %44 = vector.broadcast %36 : vector<16x1xf32> to vector<16x256xf32>
    %45 = arith.divf %43, %44 : vector<16x256xf32>
    %46 = math.floor %45 : vector<16x256xf32>
    %47 = vector.broadcast %36 : vector<16x1xf32> to vector<16x256xf32>
    %48 = arith.mulf %46, %47 : vector<16x256xf32>
    %49 = vector.broadcast %32 : vector<1x1xf32> to vector<16x256xf32>
    %50 = arith.addf %48, %49 : vector<16x256xf32>
    %51 = vector.broadcast %30 : vector<1x256xf32> to vector<16x256xf32>
    %52 = arith.subf %51, %50 : vector<16x256xf32>
    %53 = vector.broadcast %36 : vector<16x1xf32> to vector<16x256xf32>
    %54 = arith.divf %52, %53 : vector<16x256xf32>
    %c1_25 = arith.constant 1 : index
    %c0_26 = arith.constant 0 : index
    %c0_27 = arith.constant 0 : index
    %55 = vector.load %arg7[%c1_25, %c0_26, %c0_27] : memref<3x16x256xf32, #tpu.memory_space<vmem>>, vector<1x16x256xf32>
    %56 = vector.shape_cast %55 : vector<1x16x256xf32> to vector<16x256xf32>
    %57 = vector.shape_cast %54 : vector<16x256xf32> to vector<1x16x256xf32>
    tpu.vector_store %arg7[%c1_25, %c0_26, %c0_27], %57 {strides = array<i32>} : memref<3x16x256xf32, #tpu.memory_space<vmem>>, vector<1x16x256xf32>,
    %c2 = arith.constant 2 : index
    %c0_28 = arith.constant 0 : index
    %c0_29 = arith.constant 0 : index
    %58 = vector.load %arg1[%c2, %c0_28, %c0_29] : memref<3x1x256xf32, #tpu.memory_space<vmem>>, vector<1x1x256xf32>
    %59 = vector.shape_cast %58 : vector<1x1x256xf32> to vector<1x256xf32>
    %c2_30 = arith.constant 2 : index
    %c0_31 = arith.constant 0 : index
    %c0_32 = arith.constant 0 : index
    %60 = vector.load %arg2[%c2_30, %c0_31, %c0_32] : memref<3x1x1xf32, #tpu.memory_space<vmem>>, vector<1x1x1xf32>
    %61 = vector.shape_cast %60 : vector<1x1x1xf32> to vector<1x1xf32>
    %c2_33 = arith.constant 2 : index
    %c0_34 = arith.constant 0 : index
    %c0_35 = arith.constant 0 : index
    %62 = vector.load %arg3[%c2_33, %c0_34, %c0_35] : memref<3x1x1xf32, #tpu.memory_space<vmem>>, vector<1x1x1xf32>
    %63 = vector.shape_cast %62 : vector<1x1x1xf32> to vector<1x1xf32>
    %c2_36 = arith.constant 2 : index
    %c0_37 = arith.constant 0 : index
    %c0_38 = arith.constant 0 : index
    %64 = vector.load %arg4[%c2_36, %c0_37, %c0_38] : memref<3x16x1xf32, #tpu.memory_space<vmem>>, vector<1x16x1xf32>
    %65 = vector.shape_cast %64 : vector<1x16x1xf32> to vector<16x1xf32>
    %66 = vector.broadcast %61 : vector<1x1xf32> to vector<1x256xf32>
    %67 = arith.maximumf %59, %66 : vector<1x256xf32>
    %68 = vector.broadcast %63 : vector<1x1xf32> to vector<1x256xf32>
    %69 = arith.minimumf %67, %68 : vector<1x256xf32>
    %70 = vector.broadcast %61 : vector<1x1xf32> to vector<1x256xf32>
    %71 = arith.subf %69, %70 : vector<1x256xf32>
    %72 = vector.broadcast %71 : vector<1x256xf32> to vector<16x256xf32>
    %73 = vector.broadcast %65 : vector<16x1xf32> to vector<16x256xf32>
    %74 = arith.divf %72, %73 : vector<16x256xf32>
    %75 = math.floor %74 : vector<16x256xf32>
    %76 = vector.broadcast %65 : vector<16x1xf32> to vector<16x256xf32>
    %77 = arith.mulf %75, %76 : vector<16x256xf32>
    %78 = vector.broadcast %61 : vector<1x1xf32> to vector<16x256xf32>
    %79 = arith.addf %77, %78 : vector<16x256xf32>
    %80 = vector.broadcast %59 : vector<1x256xf32> to vector<16x256xf32>
    %81 = arith.subf %80, %79 : vector<16x256xf32>
    %82 = vector.broadcast %65 : vector<16x1xf32> to vector<16x256xf32>
    %83 = arith.divf %81, %82 : vector<16x256xf32>
    %c2_39 = arith.constant 2 : index
    %c0_40 = arith.constant 0 : index
    %c0_41 = arith.constant 0 : index
    %84 = vector.load %arg7[%c2_39, %c0_40, %c0_41] : memref<3x16x256xf32, #tpu.memory_space<vmem>>, vector<1x16x256xf32>
    %85 = vector.shape_cast %84 : vector<1x16x256xf32> to vector<16x256xf32>
    %86 = vector.shape_cast %83 : vector<16x256xf32> to vector<1x16x256xf32>
    tpu.vector_store %arg7[%c2_39, %c0_40, %c0_41], %86 {strides = array<i32>} : memref<3x16x256xf32, #tpu.memory_space<vmem>>, vector<1x16x256xf32>,
    %c0_42 = arith.constant 0 : index
    %c0_43 = arith.constant 0 : index
    %c0_44 = arith.constant 0 : index
    %87 = vector.load %arg7[%c0_42, %c0_43, %c0_44] : memref<3x16x256xf32, #tpu.memory_space<vmem>>, vector<1x16x256xf32>
    %88 = vector.shape_cast %87 : vector<1x16x256xf32> to vector<16x256xf32>
    %cst = arith.constant 1.000000e+00 : f32
    %89 = vector.broadcast %cst : f32 to vector<16x256xf32>
    %90 = arith.subf %89, %88 : vector<16x256xf32>
    %c1_45 = arith.constant 1 : index
    %c0_46 = arith.constant 0 : index
    %c0_47 = arith.constant 0 : index
    %91 = vector.load %arg7[%c1_45, %c0_46, %c0_47] : memref<3x16x256xf32, #tpu.memory_space<vmem>>, vector<1x16x256xf32>
    %92 = vector.shape_cast %91 : vector<1x16x256xf32> to vector<16x256xf32>
    %cst_48 = arith.constant 1.000000e+00 : f32
    %93 = vector.broadcast %cst_48 : f32 to vector<16x256xf32>
    %94 = arith.subf %93, %92 : vector<16x256xf32>
    %c2_49 = arith.constant 2 : index
    %c0_50 = arith.constant 0 : index
    %c0_51 = arith.constant 0 : index
    %95 = vector.load %arg7[%c2_49, %c0_50, %c0_51] : memref<3x16x256xf32, #tpu.memory_space<vmem>>, vector<1x16x256xf32>
    %96 = vector.shape_cast %95 : vector<1x16x256xf32> to vector<16x256xf32>
    %cst_52 = arith.constant 1.000000e+00 : f32
    %97 = vector.broadcast %cst_52 : f32 to vector<16x256xf32>
    %98 = arith.subf %97, %96 : vector<16x256xf32>
    %99 = arith.mulf %90, %94 : vector<16x256xf32>
    %c0_53 = arith.constant 0 : index
    %c0_54 = arith.constant 0 : index
    %c0_55 = arith.constant 0 : index
    %100 = vector.load %arg5[%c0_53, %c0_54, %c0_55] : memref<8x16x256xf32, #tpu.memory_space<vmem>>, vector<1x16x256xf32>
    %101 = vector.shape_cast %100 : vector<1x16x256xf32> to vector<16x256xf32>
    %102 = arith.mulf %98, %101 : vector<16x256xf32>
    %103 = arith.mulf %99, %102 : vector<16x256xf32>
    %c0_56 = arith.constant 0 : index
    %c0_57 = arith.constant 0 : index
    %c0_58 = arith.constant 0 : index
    %104 = vector.load %arg7[%c0_56, %c0_57, %c0_58] : memref<3x16x256xf32, #tpu.memory_space<vmem>>, vector<1x16x256xf32>
    %105 = vector.shape_cast %104 : vector<1x16x256xf32> to vector<16x256xf32>
    %cst_59 = arith.constant 1.000000e+00 : f32
    %106 = vector.broadcast %cst_59 : f32 to vector<16x256xf32>
    %107 = arith.subf %106, %105 : vector<16x256xf32>
    %c1_60 = arith.constant 1 : index
    %c0_61 = arith.constant 0 : index
    %c0_62 = arith.constant 0 : index
    %108 = vector.load %arg7[%c1_60, %c0_61, %c0_62] : memref<3x16x256xf32, #tpu.memory_space<vmem>>, vector<1x16x256xf32>
    %109 = vector.shape_cast %108 : vector<1x16x256xf32> to vector<16x256xf32>
    %cst_63 = arith.constant 1.000000e+00 : f32
    %110 = vector.broadcast %cst_63 : f32 to vector<16x256xf32>
    %111 = arith.subf %110, %109 : vector<16x256xf32>
    %c2_64 = arith.constant 2 : index
    %c0_65 = arith.constant 0 : index
    %c0_66 = arith.constant 0 : index
    %112 = vector.load %arg7[%c2_64, %c0_65, %c0_66] : memref<3x16x256xf32, #tpu.memory_space<vmem>>, vector<1x16x256xf32>
    %113 = vector.shape_cast %112 : vector<1x16x256xf32> to vector<16x256xf32>
    %114 = arith.mulf %107, %111 : vector<16x256xf32>
    %c1_67 = arith.constant 1 : index
    %c0_68 = arith.constant 0 : index
    %c0_69 = arith.constant 0 : index
    %115 = vector.load %arg5[%c1_67, %c0_68, %c0_69] : memref<8x16x256xf32, #tpu.memory_space<vmem>>, vector<1x16x256xf32>
    %116 = vector.shape_cast %115 : vector<1x16x256xf32> to vector<16x256xf32>
    %117 = arith.mulf %113, %116 : vector<16x256xf32>
    %118 = arith.mulf %114, %117 : vector<16x256xf32>
    %119 = arith.addf %103, %118 : vector<16x256xf32>
    %c0_70 = arith.constant 0 : index
    %c0_71 = arith.constant 0 : index
    %c0_72 = arith.constant 0 : index
    %120 = vector.load %arg7[%c0_70, %c0_71, %c0_72] : memref<3x16x256xf32, #tpu.memory_space<vmem>>, vector<1x16x256xf32>
    %121 = vector.shape_cast %120 : vector<1x16x256xf32> to vector<16x256xf32>
    %cst_73 = arith.constant 1.000000e+00 : f32
    %122 = vector.broadcast %cst_73 : f32 to vector<16x256xf32>
    %123 = arith.subf %122, %121 : vector<16x256xf32>
    %c1_74 = arith.constant 1 : index
    %c0_75 = arith.constant 0 : index
    %c0_76 = arith.constant 0 : index
    %124 = vector.load %arg7[%c1_74, %c0_75, %c0_76] : memref<3x16x256xf32, #tpu.memory_space<vmem>>, vector<1x16x256xf32>
    %125 = vector.shape_cast %124 : vector<1x16x256xf32> to vector<16x256xf32>
    %c2_77 = arith.constant 2 : index
    %c0_78 = arith.constant 0 : index
    %c0_79 = arith.constant 0 : index
    %126 = vector.load %arg7[%c2_77, %c0_78, %c0_79] : memref<3x16x256xf32, #tpu.memory_space<vmem>>, vector<1x16x256xf32>
    %127 = vector.shape_cast %126 : vector<1x16x256xf32> to vector<16x256xf32>
    %cst_80 = arith.constant 1.000000e+00 : f32
    %128 = vector.broadcast %cst_80 : f32 to vector<16x256xf32>
    %129 = arith.subf %128, %127 : vector<16x256xf32>
    %130 = arith.mulf %123, %125 : vector<16x256xf32>
    %c2_81 = arith.constant 2 : index
    %c0_82 = arith.constant 0 : index
    %c0_83 = arith.constant 0 : index
    %131 = vector.load %arg5[%c2_81, %c0_82, %c0_83] : memref<8x16x256xf32, #tpu.memory_space<vmem>>, vector<1x16x256xf32>
    %132 = vector.shape_cast %131 : vector<1x16x256xf32> to vector<16x256xf32>
    %133 = arith.mulf %129, %132 : vector<16x256xf32>
    %134 = arith.mulf %130, %133 : vector<16x256xf32>
    %135 = arith.addf %119, %134 : vector<16x256xf32>
    %c0_84 = arith.constant 0 : index
    %c0_85 = arith.constant 0 : index
    %c0_86 = arith.constant 0 : index
    %136 = vector.load %arg7[%c0_84, %c0_85, %c0_86] : memref<3x16x256xf32, #tpu.memory_space<vmem>>, vector<1x16x256xf32>
    %137 = vector.shape_cast %136 : vector<1x16x256xf32> to vector<16x256xf32>
    %cst_87 = arith.constant 1.000000e+00 : f32
    %138 = vector.broadcast %cst_87 : f32 to vector<16x256xf32>
    %139 = arith.subf %138, %137 : vector<16x256xf32>
    %c1_88 = arith.constant 1 : index
    %c0_89 = arith.constant 0 : index
    %c0_90 = arith.constant 0 : index
    %140 = vector.load %arg7[%c1_88, %c0_89, %c0_90] : memref<3x16x256xf32, #tpu.memory_space<vmem>>, vector<1x16x256xf32>
    %141 = vector.shape_cast %140 : vector<1x16x256xf32> to vector<16x256xf32>
    %c2_91 = arith.constant 2 : index
    %c0_92 = arith.constant 0 : index
    %c0_93 = arith.constant 0 : index
    %142 = vector.load %arg7[%c2_91, %c0_92, %c0_93] : memref<3x16x256xf32, #tpu.memory_space<vmem>>, vector<1x16x256xf32>
    %143 = vector.shape_cast %142 : vector<1x16x256xf32> to vector<16x256xf32>
    %144 = arith.mulf %139, %141 : vector<16x256xf32>
    %c3 = arith.constant 3 : index
    %c0_94 = arith.constant 0 : index
    %c0_95 = arith.constant 0 : index
    %145 = vector.load %arg5[%c3, %c0_94, %c0_95] : memref<8x16x256xf32, #tpu.memory_space<vmem>>, vector<1x16x256xf32>
    %146 = vector.shape_cast %145 : vector<1x16x256xf32> to vector<16x256xf32>
    %147 = arith.mulf %143, %146 : vector<16x256xf32>
    %148 = arith.mulf %144, %147 : vector<16x256xf32>
    %149 = arith.addf %135, %148 : vector<16x256xf32>
    %c0_96 = arith.constant 0 : index
    %c0_97 = arith.constant 0 : index
    %c0_98 = arith.constant 0 : index
    %150 = vector.load %arg7[%c0_96, %c0_97, %c0_98] : memref<3x16x256xf32, #tpu.memory_space<vmem>>, vector<1x16x256xf32>
    %151 = vector.shape_cast %150 : vector<1x16x256xf32> to vector<16x256xf32>
    %c1_99 = arith.constant 1 : index
    %c0_100 = arith.constant 0 : index
    %c0_101 = arith.constant 0 : index
    %152 = vector.load %arg7[%c1_99, %c0_100, %c0_101] : memref<3x16x256xf32, #tpu.memory_space<vmem>>, vector<1x16x256xf32>
    %153 = vector.shape_cast %152 : vector<1x16x256xf32> to vector<16x256xf32>
    %cst_102 = arith.constant 1.000000e+00 : f32
    %154 = vector.broadcast %cst_102 : f32 to vector<16x256xf32>
    %155 = arith.subf %154, %153 : vector<16x256xf32>
    %c2_103 = arith.constant 2 : index
    %c0_104 = arith.constant 0 : index
    %c0_105 = arith.constant 0 : index
    %156 = vector.load %arg7[%c2_103, %c0_104, %c0_105] : memref<3x16x256xf32, #tpu.memory_space<vmem>>, vector<1x16x256xf32>
    %157 = vector.shape_cast %156 : vector<1x16x256xf32> to vector<16x256xf32>
    %cst_106 = arith.constant 1.000000e+00 : f32
    %158 = vector.broadcast %cst_106 : f32 to vector<16x256xf32>
    %159 = arith.subf %158, %157 : vector<16x256xf32>
    %160 = arith.mulf %151, %155 : vector<16x256xf32>
    %c4 = arith.constant 4 : index
    %c0_107 = arith.constant 0 : index
    %c0_108 = arith.constant 0 : index
    %161 = vector.load %arg5[%c4, %c0_107, %c0_108] : memref<8x16x256xf32, #tpu.memory_space<vmem>>, vector<1x16x256xf32>
    %162 = vector.shape_cast %161 : vector<1x16x256xf32> to vector<16x256xf32>
    %163 = arith.mulf %159, %162 : vector<16x256xf32>
    %164 = arith.mulf %160, %163 : vector<16x256xf32>
    %165 = arith.addf %149, %164 : vector<16x256xf32>
    %c0_109 = arith.constant 0 : index
    %c0_110 = arith.constant 0 : index
    %c0_111 = arith.constant 0 : index
    %166 = vector.load %arg7[%c0_109, %c0_110, %c0_111] : memref<3x16x256xf32, #tpu.memory_space<vmem>>, vector<1x16x256xf32>
    %167 = vector.shape_cast %166 : vector<1x16x256xf32> to vector<16x256xf32>
    %c1_112 = arith.constant 1 : index
    %c0_113 = arith.constant 0 : index
    %c0_114 = arith.constant 0 : index
    %168 = vector.load %arg7[%c1_112, %c0_113, %c0_114] : memref<3x16x256xf32, #tpu.memory_space<vmem>>, vector<1x16x256xf32>
    %169 = vector.shape_cast %168 : vector<1x16x256xf32> to vector<16x256xf32>
    %cst_115 = arith.constant 1.000000e+00 : f32
    %170 = vector.broadcast %cst_115 : f32 to vector<16x256xf32>
    %171 = arith.subf %170, %169 : vector<16x256xf32>
    %c2_116 = arith.constant 2 : index
    %c0_117 = arith.constant 0 : index
    %c0_118 = arith.constant 0 : index
    %172 = vector.load %arg7[%c2_116, %c0_117, %c0_118] : memref<3x16x256xf32, #tpu.memory_space<vmem>>, vector<1x16x256xf32>
    %173 = vector.shape_cast %172 : vector<1x16x256xf32> to vector<16x256xf32>
    %174 = arith.mulf %167, %171 : vector<16x256xf32>
    %c5 = arith.constant 5 : index
    %c0_119 = arith.constant 0 : index
    %c0_120 = arith.constant 0 : index
    %175 = vector.load %arg5[%c5, %c0_119, %c0_120] : memref<8x16x256xf32, #tpu.memory_space<vmem>>, vector<1x16x256xf32>
    %176 = vector.shape_cast %175 : vector<1x16x256xf32> to vector<16x256xf32>
    %177 = arith.mulf %173, %176 : vector<16x256xf32>
    %178 = arith.mulf %174, %177 : vector<16x256xf32>
    %179 = arith.addf %165, %178 : vector<16x256xf32>
    %c0_121 = arith.constant 0 : index
    %c0_122 = arith.constant 0 : index
    %c0_123 = arith.constant 0 : index
    %180 = vector.load %arg7[%c0_121, %c0_122, %c0_123] : memref<3x16x256xf32, #tpu.memory_space<vmem>>, vector<1x16x256xf32>
    %181 = vector.shape_cast %180 : vector<1x16x256xf32> to vector<16x256xf32>
    %c1_124 = arith.constant 1 : index
    %c0_125 = arith.constant 0 : index
    %c0_126 = arith.constant 0 : index
    %182 = vector.load %arg7[%c1_124, %c0_125, %c0_126] : memref<3x16x256xf32, #tpu.memory_space<vmem>>, vector<1x16x256xf32>
    %183 = vector.shape_cast %182 : vector<1x16x256xf32> to vector<16x256xf32>
    %c2_127 = arith.constant 2 : index
    %c0_128 = arith.constant 0 : index
    %c0_129 = arith.constant 0 : index
    %184 = vector.load %arg7[%c2_127, %c0_128, %c0_129] : memref<3x16x256xf32, #tpu.memory_space<vmem>>, vector<1x16x256xf32>
    %185 = vector.shape_cast %184 : vector<1x16x256xf32> to vector<16x256xf32>
    %cst_130 = arith.constant 1.000000e+00 : f32
    %186 = vector.broadcast %cst_130 : f32 to vector<16x256xf32>
    %187 = arith.subf %186, %185 : vector<16x256xf32>
    %188 = arith.mulf %181, %183 : vector<16x256xf32>
    %c6 = arith.constant 6 : index
    %c0_131 = arith.constant 0 : index
    %c0_132 = arith.constant 0 : index
    %189 = vector.load %arg5[%c6, %c0_131, %c0_132] : memref<8x16x256xf32, #tpu.memory_space<vmem>>, vector<1x16x256xf32>
    %190 = vector.shape_cast %189 : vector<1x16x256xf32> to vector<16x256xf32>
    %191 = arith.mulf %187, %190 : vector<16x256xf32>
    %192 = arith.mulf %188, %191 : vector<16x256xf32>
    %193 = arith.addf %179, %192 : vector<16x256xf32>
    %c0_133 = arith.constant 0 : index
    %c0_134 = arith.constant 0 : index
    %c0_135 = arith.constant 0 : index
    %194 = vector.load %arg7[%c0_133, %c0_134, %c0_135] : memref<3x16x256xf32, #tpu.memory_space<vmem>>, vector<1x16x256xf32>
    %195 = vector.shape_cast %194 : vector<1x16x256xf32> to vector<16x256xf32>
    %c1_136 = arith.constant 1 : index
    %c0_137 = arith.constant 0 : index
    %c0_138 = arith.constant 0 : index
    %196 = vector.load %arg7[%c1_136, %c0_137, %c0_138] : memref<3x16x256xf32, #tpu.memory_space<vmem>>, vector<1x16x256xf32>
    %197 = vector.shape_cast %196 : vector<1x16x256xf32> to vector<16x256xf32>
    %c2_139 = arith.constant 2 : index
    %c0_140 = arith.constant 0 : index
    %c0_141 = arith.constant 0 : index
    %198 = vector.load %arg7[%c2_139, %c0_140, %c0_141] : memref<3x16x256xf32, #tpu.memory_space<vmem>>, vector<1x16x256xf32>
    %199 = vector.shape_cast %198 : vector<1x16x256xf32> to vector<16x256xf32>
    %200 = arith.mulf %195, %197 : vector<16x256xf32>
    %c7 = arith.constant 7 : index
    %c0_142 = arith.constant 0 : index
    %c0_143 = arith.constant 0 : index
    %201 = vector.load %arg5[%c7, %c0_142, %c0_143] : memref<8x16x256xf32, #tpu.memory_space<vmem>>, vector<1x16x256xf32>
    %202 = vector.shape_cast %201 : vector<1x16x256xf32> to vector<16x256xf32>
    %203 = arith.mulf %199, %202 : vector<16x256xf32>
    %204 = arith.mulf %200, %203 : vector<16x256xf32>
    %205 = arith.addf %193, %204 : vector<16x256xf32>
    %c0_144 = arith.constant 0 : index
    %c0_145 = arith.constant 0 : index
    %206 = vector.load %arg6[%c0_144, %c0_145] : memref<16x256xf32, #tpu.memory_space<vmem>>, vector<16x256xf32>
    tpu.vector_store %arg6[%c0_144, %c0_145], %205 {strides = array<i32>} : memref<16x256xf32, #tpu.memory_space<vmem>>, vector<16x256xf32>,
    return
  }
  func.func @transform_0(%arg0: i32) -> (i32, i32, i32) {
    %c0_i32 = arith.constant 0 : i32
    %c0_i32_0 = arith.constant 0 : i32
    %c0_i32_1 = arith.constant 0 : i32
    return %c0_i32, %c0_i32_0, %arg0 : i32, i32, i32
  }
  func.func @transform_1(%arg0: i32) -> (i32, i32, i32) {
    %c0_i32 = arith.constant 0 : i32
    %c0_i32_0 = arith.constant 0 : i32
    %c0_i32_1 = arith.constant 0 : i32
    %c0_i32_2 = arith.constant 0 : i32
    return %c0_i32, %c0_i32_0, %c0_i32_1 : i32, i32, i32
  }
  func.func @transform_2(%arg0: i32) -> (i32, i32, i32) {
    %c0_i32 = arith.constant 0 : i32
    %c0_i32_0 = arith.constant 0 : i32
    %c0_i32_1 = arith.constant 0 : i32
    %c0_i32_2 = arith.constant 0 : i32
    return %c0_i32, %c0_i32_0, %c0_i32_1 : i32, i32, i32
  }
  func.func @transform_3(%arg0: i32) -> (i32, i32, i32) {
    %c0_i32 = arith.constant 0 : i32
    %c0_i32_0 = arith.constant 0 : i32
    %c0_i32_1 = arith.constant 0 : i32
    %c0_i32_2 = arith.constant 0 : i32
    return %c0_i32, %c0_i32_0, %c0_i32_1 : i32, i32, i32
  }
  func.func @transform_4(%arg0: i32) -> (i32, i32, i32) {
    %c0_i32 = arith.constant 0 : i32
    %c0_i32_0 = arith.constant 0 : i32
    %c0_i32_1 = arith.constant 0 : i32
    return %c0_i32, %c0_i32_0, %arg0 : i32, i32, i32
  }
  func.func @transform_5(%arg0: i32) -> (i32, i32) {
    %c0_i32 = arith.constant 0 : i32
    %c0_i32_0 = arith.constant 0 : i32
    return %c0_i32, %arg0 : i32, i32
  }
}

</mosaic_0001>

<bundles_post_ra>
// kernel: sub.1
= control target key start
LH: loop header
LB: loop body
LE: loop exit
PB: predicated region body
PF: predicated region fallthrough
CT: control target
= control target key end

     0   :  { %3 = vsyncpa [#allocation1], 0  ;;  %s104_s0 = inlined_call_operand.hbm [shape: f32[3], index: 0, kind: input, shape index: {}]   ;;  %s105_s1 = inlined_call_operand.hbm [shape: f32[3], index: 1, kind: input, shape index: {}]   ;;  %s106_s2 = inlined_call_operand.vmem [shape: f32[3], index: 2, kind: output, shape index: {}]  }
   0x1   :  { %4 = vsyncpa [#allocation3], 0  ;;  %s78_s9 = smov [#allocation0]   ;;  %s79_s11 = smov [#allocation2]  }
   0x2   :  { %s9_s10 = sshll.u32 %s78_s9, 4  ;;  %s17_s12 = sshll.u32 %s79_s11, 4  ;;  %s10_s10 = int_to_ptr.vmem [resolvable:$true] %s9_s10  ;;  %s18_s12 = int_to_ptr.vmem [resolvable:$true] %s17_s12 }
   0x3   :  { %s42_s13 = scalar_lea.vmem %s10_s10, 16  ;;  %s46_s14 = scalar_lea.vmem %s10_s10, 32 }
   0x4   :  { %p43_p0 = scmp.ne.s32.totalorder %s10_s10, %s42_s13  ;;  %p47_p1 = scmp.lt.s32.totalorder %s10_s10, %s10_s10 }
   0x5   :  { %p48_p2 = scmp.lt.s32.totalorder %s46_s14, %s42_s13 }
   0x7   :  { %p49_p3 = por %p48_p2, %p47_p1 }
   0x9   :  { %p50_p4 = pnand %p49_p3, %p43_p0 }
   0xb   :  { %53 = shalt.err (!%p50_p4)
}
   0xc   :  { %12 = dma.hbm_to_vmem [thread:$0]  %s104_s0, 16, %s10_s10, [#allocation1]  }
   0xd   :  { %s62_s0 = scalar_lea.vmem %s18_s12, 16  ;;  %s66_s17 = scalar_lea.vmem %s18_s12, 32 }
   0xe   :  { %p63_p5 = scmp.ne.s32.totalorder %s18_s12, %s62_s0  ;;  %p67_p6 = scmp.lt.s32.totalorder %s18_s12, %s18_s12 }
   0xf   :  { %p68_p7 = scmp.lt.s32.totalorder %s66_s17, %s62_s0 }
  0x11   :  { %p69_p8 = por %p68_p7, %p67_p6 }
  0x13   :  { %p70_p9 = pnand %p69_p8, %p63_p5 }
  0x15   :  { %73 = shalt.err (!%p70_p9)
}
  0x16   :  { %20 = dma.hbm_to_vmem [thread:$0]  %s105_s1, 16, %s18_s12, [#allocation3]  }
  0x17   :  { %74 = dma.done.wait [#allocation1], 16  }
  0x18   :  { %75 = vsyncadd [#allocation1], 4294967280 }
  0x19   :  { %76 = dma.done.wait [#allocation3], 16  }
  0x1a   :  { %77 = vsyncadd [#allocation3], 4294967280  ;;  %v23_v0 = vld [vmem:[#allocation0] sm:$0x1]  ;;  %v24_v1 = vld [vmem:[#allocation2] sm:$0x1] }
  0x1b   :  { %v27_v2 = vsub.f32 %v23_v0, %v24_v1 }
  0x1d   :  { %29 = vst [vmem:[%s106_s2] sm:$0x1] %v27_v2 }
  0x1e   :  { %30 = vsyncpa [#allocation1], 1 }
  0x1f   :  { %31 = vsyncpa [#allocation3], 1 }

// kernel: hash_embed.2
= control target key start
LH: loop header
LB: loop body
LE: loop exit
PB: predicated region body
PF: predicated region fallthrough
CT: control target
= control target key end

     0   :  { %v403_v0 = vmov 0   ;;  %v30_v17 = vlaneseq  ;;  %s533_s3 = inlined_call_operand.vmem [shape: f32[3,16,1], index: 3, kind: input, shape index: {}]   ;;  %s534_s1 = inlined_call_operand.vmem [shape: f32[3,1,1], index: 1, kind: input, shape index: {}]   ;;  %s535_s2 = inlined_call_operand.vmem [shape: f32[3,1,1], index: 2, kind: input, shape index: {}]   ;;  %s536_s4 = inlined_call_operand.vmem [shape: s32[16,1], index: 4, kind: input, shape index: {}]   ;;  %s537_s0 = inlined_call_operand.vmem [shape: f32[3,1,128], index: 0, kind: input, shape index: {}]   ;;  %s538_s5 = inlined_call_operand.vmem [shape: s32[8,16,128], index: 5, kind: output, shape index: {}]  }
   0x1   :  { %390 = vset.pattern.permute.xlu1 %v403_v0  ;;  %389 = vset.pattern.permute.xlu0 %v403_v0  ;;  %v355_v1 = vld [vmem:[%s533_s3 + $0x10] sm:$0xff]  ;;  %v23_v2 = vld [vmem:[%s533_s3] sm:$0xff]  ;;  %v356_v3 = vld [vmem:[%s533_s3 + $0x18] sm:$0xff] }
   0x2   :  { %115 = vperm.xlu0 %389, %v355_v1   ;;  %54 = vperm.xlu1 %390, %v23_v2   ;;  %v24_v4 = vld [vmem:[%s533_s3 + $0x8] sm:$0xff]  ;;  %v360_v5 = vld [vmem:[%s533_s3 + $0x20] sm:$0xff]  ;;  %v31_v20 = vshrl.u32 %v30_v17, 7 }
   0x3   :  { %v361_v6 = vld [vmem:[%s533_s3 + $0x28] sm:$0xff]  ;;  %v353_v7 = vld [vmem:[%s534_s1 + $0x1] sm:$0x1]  ;;  %v21_v8 = vld [vmem:[%s534_s1] sm:$0x1] }
   0x4   :  { %v354_v9 = vld [vmem:[%s535_s2 + $0x1] sm:$0x1]  ;;  %v358_v10 = vld [vmem:[%s534_s1 + $0x2] sm:$0x1]  ;;  %v22_v11 = vld [vmem:[%s535_s2] sm:$0x1] }
   0x5   :  { %v359_v12 = vld [vmem:[%s535_s2 + $0x2] sm:$0x1]  ;;  %v206_v14 = vld [vmem:[%s536_s4 + $0x8] sm:$0xff]  ;;  %v32_v23 = vsub.s32 0, %v31_v20  ;;  %v352_v27 = vld [vmem:[%s537_s0 + $0x1] sm:$0x1] }
   0x6   :  { %120 = vperm.xlu0 %389, %v356_v3   ;;  %59 = vperm.xlu1 %390, %v24_v4   ;;  %v205_v13 = vld [vmem:[%s536_s4] sm:$0xff] }
   0x7   :  { %v20_v32 = vld [vmem:[%s537_s0] sm:$0x1]  ;;  %v357_v35 = vld [vmem:[%s537_s0 + $0x2] sm:$0x1] }
   0xa   :  { %179 = vperm.xlu0 %389, %v360_v5   ;;  %184 = vperm.xlu1 %390, %v361_v6  }
   0xe   :  { %88 = vperm.xlu0 %389, %v353_v7   ;;  %27 = vperm.xlu1 %390, %v21_v8  }
  0x12   :  { %98 = vperm.xlu0 %389, %v354_v9   ;;  %152 = vperm.xlu1 %390, %v358_v10  }
  0x16   :  { %37 = vperm.xlu0 %389, %v22_v11   ;;  %162 = vperm.xlu1 %390, %v359_v12  }
  0x1a   :  { %220 = vperm.xlu0 %389, %v205_v13   ;;  %223 = vperm.xlu1 %390, %v206_v14  }
  0x7d   :  { %v116_v15 = vpop.permute.xlu0 %115  ;;  %v55_v16 = vpop.permute.xlu1 %54 }
  0x7e   :  { %391 = vrcp.f32 %v116_v15 }
  0x81   :  { %v121_v18 = vpop.permute.xlu0 %120  ;;  %v60_v19 = vpop.permute.xlu1 %59 }
  0x82   :  { %393 = vrcp.f32 %v121_v18 }
  0x83   :  { %395 = vrcp.f32 %v55_v16 }
  0x84   :  { %397 = vrcp.f32 %v60_v19 }
  0x85   :  { %v180_v21 = vpop.permute.xlu0 %179  ;;  %v185_v22 = vpop.permute.xlu1 %184 }
  0x86   :  { %399 = vrcp.f32 %v180_v21 }
  0x87   :  { %401 = vrcp.f32 %v185_v22 }
  0x89   :  { %v89_v24 = vpop.permute.xlu0 %88  ;;  %v28_v25 = vpop.permute.xlu1 %27 }
  0x8a   :  { %v94_v26 = vrot.slane %v89_v24, %v32_v23  ;;  %v33_v28 = vrot.slane %v28_v25, %v32_v23 }
  0x8b   :  { %v392_v44 = vpop.eup %391 }
  0x8c   :  { %v95_v31 = vmax.f32 %v352_v27, %v94_v26  ;;  %v34_v37 = vmax.f32 %v20_v32, %v33_v28 }
  0x8d   :  { %v99_v29 = vpop.permute.xlu0 %98  ;;  %v153_v30 = vpop.permute.xlu1 %152 }
  0x8e   :  { %v104_v33 = vrot.slane %v99_v29, %v32_v23  ;;  %v158_v34 = vrot.slane %v153_v30, %v32_v23 }
  0x8f   :  { %v394_v48 = vpop.eup %393 }
  0x90   :  { %v105_v36 = vmin.f32 %v95_v31, %v104_v33  ;;  %v159_v41 = vmax.f32 %v357_v35, %v158_v34  ;;  %v396_v53 = vpop.eup %395 }
  0x91   :  { %v38_v38 = vpop.permute.xlu0 %37  ;;  %v163_v39 = vpop.permute.xlu1 %162 }
  0x92   :  { %v106_v40 = vsub.f32 %v105_v36, %v94_v26  ;;  %v43_v42 = vrot.slane %v38_v38, %v32_v23  ;;  %v168_v43 = vrot.slane %v163_v39, %v32_v23  ;;  %v398_v54 = vpop.eup %397 }
  0x93   :  { %v400_v59 = vpop.eup %399 }
  0x94   :  { %v111_v45 = vrot.slane %v106_v40, %v32_v23  ;;  %v44_v46 = vmin.f32 %v34_v37, %v43_v42  ;;  %v169_v47 = vmin.f32 %v159_v41, %v168_v43  ;;  %v402_v60 = vpop.eup %401 }
  0x96   :  { %v124_v49 = vmul.f32 %v392_v44, %v111_v45  ;;  %v126_v50 = vmul.f32 %v394_v48, %v111_v45  ;;  %v45_v51 = vsub.f32 %v44_v46, %v33_v28  ;;  %v170_v52 = vsub.f32 %v169_v47, %v158_v34  ;;  %v221_v45 = vpop.permute.xlu0 %220 }
  0x98   :  { %v127_v55 = vfloor.f32 %v124_v49  ;;  %v128_v56 = vfloor.f32 %v126_v50  ;;  %v50_v57 = vrot.slane %v45_v51, %v32_v23  ;;  %v175_v58 = vrot.slane %v170_v52, %v32_v23 }
  0x9a   :  { %v380_v61 = vtrunc.f32 %v127_v55  ;;  %v382_v62 = vtrunc.f32 %v128_v56  ;;  %v63_v63 = vmul.f32 %v396_v53, %v50_v57  ;;  %v65_v0 = vmul.f32 %v398_v54, %v50_v57 }
  0x9b   :  { %v188_v1 = vmul.f32 %v400_v59, %v175_v58  ;;  %v190_v2 = vmul.f32 %v402_v60, %v175_v58 }
  0x9c   :  { %v381_v3 = vcvt.f32.s32 %v380_v61  ;;  %v383_v4 = vcvt.f32.s32 %v382_v62  ;;  %v66_v5 = vfloor.f32 %v63_v63  ;;  %v67_v6 = vfloor.f32 %v65_v0  ;;  %v224_v0 = vpop.permute.xlu1 %223 }
  0x9d   :  { %v191_v7 = vfloor.f32 %v188_v1  ;;  %v192_v8 = vfloor.f32 %v190_v2 }
  0x9e   :  { %v131_v9 = vmul.u32 2654435761, %v381_v3  ;;  %v132_v10 = vmul.u32 2654435761, %v383_v4  ;;  %v376_v11 = vtrunc.f32 %v66_v5  ;;  %v378_v12 = vtrunc.f32 %v67_v6 }
  0x9f   :  { %v384_v13 = vtrunc.f32 %v191_v7  ;;  %v386_v14 = vtrunc.f32 %v192_v8 }
  0xa0   :  { %v136_v15 = vadd.s32 2654435761, %v131_v9  ;;  %v137_v16 = vadd.s32 2654435761, %v132_v10  ;;  %v377_v17 = vcvt.f32.s32 %v376_v11  ;;  %v379_v18 = vcvt.f32.s32 %v378_v12 }
  0xa1   :  { %v385_v19 = vcvt.f32.s32 %v384_v13  ;;  %v387_v20 = vcvt.f32.s32 %v386_v14 }
  0xa2   :  { %v72_v21 = vadd.s32 1, %v377_v17  ;;  %v73_v22 = vadd.s32 1, %v379_v18  ;;  %v211_v23 = vxor.u32 %v377_v17, %v131_v9  ;;  %v212_v24 = vxor.u32 %v379_v18, %v132_v10 }
  0xa3   :  { %v250_v25 = vxor.u32 %v377_v17, %v136_v15  ;;  %v251_v26 = vxor.u32 %v379_v18, %v137_v16  ;;  %v195_v27 = vmul.u32 805459861, %v385_v19  ;;  %v196_v28 = vmul.u32 805459861, %v387_v20 }
  0xa4   :  { %v284_v29 = vxor.u32 %v131_v9, %v72_v21  ;;  %v285_v30 = vxor.u32 %v132_v10, %v73_v22  ;;  %v318_v31 = vxor.u32 %v136_v15, %v72_v21  ;;  %v319_v32 = vxor.u32 %v137_v16, %v73_v22 }
  0xa5   :  { %v200_v33 = vadd.s32 805459861, %v195_v27  ;;  %v201_v34 = vadd.s32 805459861, %v196_v28  ;;  %v215_v35 = vxor.u32 %v211_v23, %v195_v27  ;;  %v254_v36 = vxor.u32 %v250_v25, %v195_v27 }
  0xa6   :  { %v288_v37 = vxor.u32 %v284_v29, %v195_v27  ;;  %v322_v38 = vxor.u32 %v318_v31, %v195_v27  ;;  %v216_v39 = vxor.u32 %v212_v24, %v196_v28  ;;  %v255_v40 = vxor.u32 %v251_v26, %v196_v28 }
  0xa7   :  { %v217_v41 = vand.u32 524287, %v215_v35  ;;  %v237_v42 = vxor.u32 %v211_v23, %v200_v33  ;;  %v256_v43 = vand.u32 524287, %v254_v36  ;;  %v271_v44 = vxor.u32 %v250_v25, %v200_v33 }
  0xa8   :  { %v290_v46 = vand.u32 524287, %v288_v37  ;;  %v305_v47 = vxor.u32 %v284_v29, %v200_v33  ;;  %v324_v48 = vand.u32 524287, %v322_v38  ;;  %v339_v49 = vxor.u32 %v318_v31, %v200_v33 }
  0xa9   :  { %v225_v50 = vadd.s32 %v221_v45, %v217_v41  ;;  %v239_v51 = vand.u32 524287, %v237_v42  ;;  %v258_v52 = vadd.s32 %v256_v43, %v221_v45  ;;  %v273_v53 = vand.u32 524287, %v271_v44 }
  0xaa   :  { %v292_v54 = vadd.s32 %v290_v46, %v221_v45  ;;  %v307_v55 = vand.u32 524287, %v305_v47  ;;  %v326_v56 = vadd.s32 %v324_v48, %v221_v45  ;;  %v341_v57 = vand.u32 524287, %v339_v49 }
  0xab   :  { %227 = vst [vmem:[%s538_s5] sm:$0xff] %v225_v50  ;;  %v241_v58 = vadd.s32 %v239_v51, %v221_v45  ;;  %364 = vst [vmem:[%s538_s5 + $0x20] sm:$0xff] %v258_v52  ;;  %v275_v59 = vadd.s32 %v273_v53, %v221_v45  ;;  %v218_v60 = vand.u32 524287, %v216_v39  ;;  %v238_v61 = vxor.u32 %v212_v24, %v201_v34 }
  0xac   :  { %368 = vst [vmem:[%s538_s5 + $0x40] sm:$0xff] %v292_v54  ;;  %v309_v62 = vadd.s32 %v307_v55, %v221_v45  ;;  %372 = vst [vmem:[%s538_s5 + $0x60] sm:$0xff] %v326_v56  ;;  %v343_v63 = vadd.s32 %v341_v57, %v221_v45  ;;  %v257_v1 = vand.u32 524287, %v255_v40  ;;  %v272_v2 = vxor.u32 %v251_v26, %v201_v34 }
  0xad   :  { %362 = vst [vmem:[%s538_s5 + $0x10] sm:$0xff] %v241_v58  ;;  %366 = vst [vmem:[%s538_s5 + $0x30] sm:$0xff] %v275_v59  ;;  %v226_v3 = vadd.s32 %v224_v0, %v218_v60  ;;  %v240_v4 = vand.u32 524287, %v238_v61  ;;  %v289_v5 = vxor.u32 %v285_v30, %v196_v28  ;;  %v306_v6 = vxor.u32 %v285_v30, %v201_v34 }
  0xae   :  { %370 = vst [vmem:[%s538_s5 + $0x50] sm:$0xff] %v309_v62  ;;  %374 = vst [vmem:[%s538_s5 + $0x70] sm:$0xff] %v343_v63  ;;  %v259_v7 = vadd.s32 %v257_v1, %v224_v0  ;;  %v274_v8 = vand.u32 524287, %v272_v2  ;;  %v323_v9 = vxor.u32 %v319_v32, %v196_v28  ;;  %v340_v10 = vxor.u32 %v319_v32, %v201_v34 }
  0xaf   :  { %228 = vst [vmem:[%s538_s5 + $0x8] sm:$0xff] %v226_v3  ;;  %v242_v11 = vadd.s32 %v240_v4, %v224_v0  ;;  %v291_v12 = vand.u32 524287, %v289_v5  ;;  %v308_v13 = vand.u32 524287, %v306_v6 }
  0xb0   :  { %365 = vst [vmem:[%s538_s5 + $0x28] sm:$0xff] %v259_v7  ;;  %v276_v14 = vadd.s32 %v274_v8, %v224_v0  ;;  %v325_v15 = vand.u32 524287, %v323_v9  ;;  %v342_v16 = vand.u32 524287, %v340_v10 }
  0xb1   :  { %363 = vst [vmem:[%s538_s5 + $0x18] sm:$0xff] %v242_v11  ;;  %v293_v17 = vadd.s32 %v291_v12, %v224_v0  ;;  %v310_v18 = vadd.s32 %v308_v13, %v224_v0 }
  0xb2   :  { %367 = vst [vmem:[%s538_s5 + $0x38] sm:$0xff] %v276_v14  ;;  %v327_v19 = vadd.s32 %v325_v15, %v224_v0  ;;  %v344_v20 = vadd.s32 %v342_v16, %v224_v0 }
  0xb3   :  { %369 = vst [vmem:[%s538_s5 + $0x48] sm:$0xff] %v293_v17  ;;  %371 = vst [vmem:[%s538_s5 + $0x58] sm:$0xff] %v310_v18 }
  0xb4   :  { %373 = vst [vmem:[%s538_s5 + $0x68] sm:$0xff] %v327_v19  ;;  %375 = vst [vmem:[%s538_s5 + $0x78] sm:$0xff] %v344_v20 }

// kernel: hash_embed.3
= control target key start
LH: loop header
LB: loop body
LE: loop exit
PB: predicated region body
PF: predicated region fallthrough
CT: control target
= control target key end

     0   :  { %v550_v0 = vmov 0   ;;  %v30_v7 = vlaneseq  ;;  %s908_s3 = inlined_call_operand.vmem [shape: f32[3,16,1], index: 3, kind: input, shape index: {}]   ;;  %s909_s1 = inlined_call_operand.vmem [shape: f32[3,1,1], index: 1, kind: input, shape index: {}]   ;;  %s910_s2 = inlined_call_operand.vmem [shape: f32[3,1,1], index: 2, kind: input, shape index: {}]   ;;  %s911_s0 = inlined_call_operand.vmem [shape: f32[3,1,256], index: 0, kind: input, shape index: {}]   ;;  %s912_s4 = inlined_call_operand.vmem [shape: f32[8,16,256], index: 4, kind: input, shape index: {}]   ;;  %s913_s5 = inlined_call_operand.vmem [shape: f32[16,256], index: 5, kind: output, shape index: {}]  }
   0x1   :  { %537 = vset.pattern.permute.xlu1 %v550_v0  ;;  %536 = vset.pattern.permute.xlu0 %v550_v0  ;;  %v500_v1 = vld [vmem:[%s908_s3 + $0x10] sm:$0xff]  ;;  %v23_v2 = vld [vmem:[%s908_s3] sm:$0xff]  ;;  %v501_v3 = vld [vmem:[%s908_s3 + $0x18] sm:$0xff] }
   0x2   :  { %159 = vperm.xlu1 %537, %v500_v1   ;;  %59 = vperm.xlu0 %536, %v23_v2   ;;  %v24_v4 = vld [vmem:[%s908_s3 + $0x8] sm:$0xff]  ;;  %v505_v6 = vld [vmem:[%s908_s3 + $0x20] sm:$0xff]  ;;  %v31_v10 = vshrl.u32 %v30_v7, 7 }
   0x3   :  { %v506_v5 = vld [vmem:[%s908_s3 + $0x28] sm:$0xff]  ;;  %v498_v8 = vld [vmem:[%s909_s1 + $0x1] sm:$0x1]  ;;  %v21_v9 = vld [vmem:[%s909_s1] sm:$0x1] }
   0x4   :  { %v22_v11 = vld [vmem:[%s910_s2] sm:$0x1]  ;;  %v503_v12 = vld [vmem:[%s909_s1 + $0x2] sm:$0x1]  ;;  %v611_v13 = vsub.s32 0, %v31_v10  ;;  %v641_v35 = vsub.s32 1, %v31_v10 }
   0x5   :  { %v504_v14 = vld [vmem:[%s910_s2 + $0x2] sm:$0x1]  ;;  %v499_v15 = vld [vmem:[%s910_s2 + $0x1] sm:$0x1]  ;;  %v647_v42 = vld [vmem:[%s911_s0 + $0x4] sm:$0x3] }
   0x6   :  { %164 = vperm.xlu1 %537, %v501_v3   ;;  %64 = vperm.xlu0 %536, %v24_v4   ;;  %v184_v16 = vrot.slane %v498_v8, %v611_v13  ;;  %v84_v17 = vrot.slane %v21_v9, %v611_v13  ;;  %v285_v18 = vrot.slane %v503_v12, %v611_v13  ;;  %v20_v28 = vld [vmem:[%s911_s0] sm:$0x3]  ;;  %v497_v34 = vld [vmem:[%s911_s0 + $0x2] sm:$0x3] }
   0x7   :  { %v197_v62 = vrot.slane %v497_v34, %v611_v13  ;;  %v201_v10 = vrot.slane %v497_v34, %v641_v35 }
   0xa   :  { %265 = vperm.xlu1 %537, %v506_v5   ;;  %260 = vperm.xlu0 %536, %v505_v6  }
   0xe   :  { %127 = vperm.xlu1 %537, %v498_v8   ;;  %27 = vperm.xlu0 %536, %v21_v9  }
  0x12   :  { %37 = vperm.xlu1 %537, %v22_v11   ;;  %228 = vperm.xlu0 %536, %v503_v12   ;;  %v97_v11 = vrot.slane %v20_v28, %v611_v13  ;;  %v101_v12 = vrot.slane %v20_v28, %v641_v35 }
  0x16   :  { %238 = vperm.xlu1 %537, %v504_v14   ;;  %137 = vperm.xlu0 %536, %v499_v15  }
  0x1a   :  { %186 = vperm.xlu1 %537, %v184_v16   ;;  %86 = vperm.xlu0 %536, %v84_v17  }
  0x1e   :  { %287 = vperm.xlu0 %536, %v285_v18  }
  0x7d   :  { %v622_v19 = vpop.permute.xlu1 %159  ;;  %v60_v20 = vpop.permute.xlu0 %59 }
  0x7e   :  { %538 = vrcp.f32 %v60_v20 }
  0x81   :  { %v624_v21 = vpop.permute.xlu1 %164  ;;  %v65_v22 = vpop.permute.xlu0 %64 }
  0x82   :  { %540 = vrcp.f32 %v65_v22 }
  0x83   :  { %542 = vrcp.f32 %v622_v19 }
  0x84   :  { %544 = vrcp.f32 %v624_v21 }
  0x85   :  { %v626_v23 = vpop.permute.xlu1 %265  ;;  %v628_v24 = vpop.permute.xlu0 %260 }
  0x86   :  { %546 = vrcp.f32 %v626_v23 }
  0x87   :  { %548 = vrcp.f32 %v628_v24 }
  0x89   :  { %v128_v25 = vpop.permute.xlu1 %127  ;;  %v28_v26 = vpop.permute.xlu0 %27 }
  0x8a   :  { %v33_v27 = vrot.slane %v28_v26, %v611_v13  ;;  %v133_v31 = vrot.slane %v128_v25, %v611_v13 }
  0x8b   :  { %v651_v45 = vpop.eup %538 }
  0x8c   :  { %v34_v32 = vmax.f32 %v20_v28, %v33_v27  ;;  %v134_v40 = vmax.f32 %v497_v34, %v133_v31 }
  0x8d   :  { %v38_v29 = vpop.permute.xlu1 %37  ;;  %v229_v30 = vpop.permute.xlu0 %228 }
  0x8e   :  { %v43_v33 = vrot.slane %v38_v29, %v611_v13  ;;  %v234_v37 = vrot.slane %v229_v30, %v611_v13 }
  0x8f   :  { %v656_v49 = vpop.eup %540 }
  0x90   :  { %v44_v36 = vmin.f32 %v34_v32, %v43_v33  ;;  %v235_v50 = vmax.f32 %v647_v42, %v234_v37  ;;  %v543_v61 = vpop.eup %542 }
  0x91   :  { %v239_v38 = vpop.permute.xlu1 %238  ;;  %v138_v39 = vpop.permute.xlu0 %137 }
  0x92   :  { %v45_v41 = vsub.f32 %v44_v36, %v33_v27  ;;  %v143_v43 = vrot.slane %v138_v39, %v611_v13  ;;  %v244_v44 = vrot.slane %v239_v38, %v611_v13  ;;  %v545_v1 = vpop.eup %544 }
  0x93   :  { %v676_v36 = vpop.eup %546 }
  0x94   :  { %v50_v46 = vrot.slane %v45_v41, %v611_v13  ;;  %v54_v47 = vrot.slane %v45_v41, %v641_v35  ;;  %v144_v48 = vmin.f32 %v134_v40, %v143_v43  ;;  %v245_v55 = vmin.f32 %v235_v50, %v244_v44  ;;  %v678_v41 = vpop.eup %548 }
  0x95   :  { %v87_v25 = vpop.permute.xlu0 %86  ;;  %v187_v34 = vpop.permute.xlu1 %186 }
  0x96   :  { %v68_v51 = vmul.f32 %v651_v45, %v50_v46  ;;  %v69_v52 = vmul.f32 %v651_v45, %v54_v47  ;;  %v71_v53 = vmul.f32 %v656_v49, %v50_v46  ;;  %v72_v54 = vmul.f32 %v656_v49, %v54_v47 }
  0x97   :  { %v145_v56 = vsub.f32 %v144_v48, %v133_v31  ;;  %v246_v14 = vsub.f32 %v245_v55, %v234_v37 }
  0x98   :  { %v73_v57 = vfloor.f32 %v68_v51  ;;  %v74_v58 = vfloor.f32 %v69_v52  ;;  %v75_v59 = vfloor.f32 %v71_v53  ;;  %v76_v60 = vfloor.f32 %v72_v54 }
  0x99   :  { %v150_v63 = vrot.slane %v145_v56, %v611_v13  ;;  %v154_v0 = vrot.slane %v145_v56, %v641_v35  ;;  %v251_v28 = vrot.slane %v246_v14, %v611_v13  ;;  %v255_v33 = vrot.slane %v246_v14, %v641_v35 }
  0x9a   :  { %v77_v2 = vmul.f32 %v73_v57, %v60_v20  ;;  %v78_v3 = vmul.f32 %v74_v58, %v60_v20  ;;  %v79_v4 = vmul.f32 %v75_v59, %v65_v22  ;;  %v80_v5 = vmul.f32 %v76_v60, %v65_v22 }
  0x9b   :  { %v168_v6 = vmul.f32 %v543_v61, %v150_v63  ;;  %v169_v7 = vmul.f32 %v543_v61, %v154_v0  ;;  %v171_v8 = vmul.f32 %v545_v1, %v150_v63  ;;  %v172_v9 = vmul.f32 %v545_v1, %v154_v0 }
  0x9c   :  { %v89_v26 = vadd.f32 %v87_v25, %v77_v2  ;;  %v90_v20 = vadd.f32 %v87_v25, %v78_v3  ;;  %v91_v27 = vadd.f32 %v87_v25, %v79_v4  ;;  %v92_v22 = vadd.f32 %v87_v25, %v80_v5 }
  0x9d   :  { %v173_v15 = vfloor.f32 %v168_v6  ;;  %v174_v16 = vfloor.f32 %v169_v7  ;;  %v175_v17 = vfloor.f32 %v171_v8  ;;  %v176_v18 = vfloor.f32 %v172_v9 }
  0x9e   :  { %v104_v43 = vsub.f32 %v97_v11, %v89_v26  ;;  %v105_v44 = vsub.f32 %v101_v12, %v90_v20  ;;  %v107_v46 = vsub.f32 %v101_v12, %v92_v22  ;;  %v269_v51 = vmul.f32 %v678_v41, %v251_v28 }
  0x9f   :  { %v177_v29 = vmul.f32 %v173_v15, %v622_v19  ;;  %v178_v30 = vmul.f32 %v174_v16, %v622_v19  ;;  %v179_v31 = vmul.f32 %v175_v17, %v624_v21  ;;  %v180_v32 = vmul.f32 %v176_v18, %v624_v21  ;;  %v288_v17 = vpop.permute.xlu0 %287 }
  0xa0   :  { %v106_v19 = vsub.f32 %v97_v11, %v91_v27  ;;  %v270_v52 = vmul.f32 %v678_v41, %v255_v33  ;;  %v272_v53 = vmul.f32 %v676_v36, %v251_v28  ;;  %v273_v54 = vmul.f32 %v676_v36, %v255_v33 }
  0xa1   :  { %v189_v37 = vadd.f32 %v187_v34, %v177_v29  ;;  %v190_v38 = vadd.f32 %v187_v34, %v178_v30  ;;  %v191_v39 = vadd.f32 %v187_v34, %v179_v31  ;;  %v192_v40 = vadd.f32 %v187_v34, %v180_v32 }
  0xa2   :  { %v108_v55 = vmul.f32 %v651_v45, %v104_v43  ;;  %v109_v56 = vmul.f32 %v651_v45, %v105_v44  ;;  %v110_v57 = vmul.f32 %v656_v49, %v106_v19  ;;  %v111_v58 = vmul.f32 %v656_v49, %v107_v46  ;;  %v509_v43 = vld [vmem:[%s912_s4 + $0x30] sm:$0xff]  ;;  %v510_v44 = vld [vmem:[%s912_s4 + $0x38] sm:$0xff] }
  0xa3   :  { %v204_v47 = vsub.f32 %v197_v62, %v189_v37  ;;  %v205_v48 = vsub.f32 %v201_v10, %v190_v38  ;;  %v206_v21 = vsub.f32 %v197_v62, %v191_v39  ;;  %v207_v50 = vsub.f32 %v201_v10, %v192_v40  ;;  %v507_v38 = vld [vmem:[%s912_s4 + $0x20] sm:$0xff]  ;;  %v508_v39 = vld [vmem:[%s912_s4 + $0x28] sm:$0xff] }
  0xa4   :  { %v274_v0 = vfloor.f32 %v269_v51  ;;  %v275_v2 = vfloor.f32 %v270_v52  ;;  %v276_v3 = vfloor.f32 %v272_v53  ;;  %v277_v4 = vfloor.f32 %v273_v54  ;;  %v346_v40 = vld [vmem:[%s912_s4] sm:$0xff]  ;;  %v347_v53 = vld [vmem:[%s912_s4 + $0x8] sm:$0xff] }
  0xa5   :  { %v208_v59 = vmul.f32 %v543_v61, %v204_v47  ;;  %v209_v60 = vmul.f32 %v543_v61, %v205_v48  ;;  %v210_v62 = vmul.f32 %v545_v1, %v206_v21  ;;  %v211_v63 = vmul.f32 %v545_v1, %v207_v50 }
  0xa6   :  { %v298_v5 = vrot.slane %v647_v42, %v611_v13  ;;  %v302_v6 = vrot.slane %v647_v42, %v641_v35  ;;  %v322_v7 = vsub.f32 1.0, %v108_v55  ;;  %v323_v45 = vsub.f32 1.0, %v109_v56 }
  0xa7   :  { %v324_v8 = vsub.f32 1.0, %v110_v57  ;;  %v325_v9 = vsub.f32 1.0, %v111_v58  ;;  %v330_v10 = vsub.f32 1.0, %v208_v59  ;;  %v331_v49 = vsub.f32 1.0, %v209_v60 }
  0xa8   :  { %v332_v11 = vsub.f32 1.0, %v210_v62  ;;  %v333_v61 = vsub.f32 1.0, %v211_v63  ;;  %v278_v1 = vmul.f32 %v274_v0, %v628_v24  ;;  %v279_v12 = vmul.f32 %v275_v2, %v628_v24  ;;  %v512_v0 = vld [vmem:[%s912_s4 + $0x48] sm:$0xff]  ;;  %v513_v2 = vld [vmem:[%s912_s4 + $0x50] sm:$0xff] }
  0xa9   :  { %v280_v14 = vmul.f32 %v276_v3, %v626_v23  ;;  %v281_v15 = vmul.f32 %v277_v4, %v626_v23  ;;  %v696_v13 = vmul.f32 %v322_v7, %v208_v59  ;;  %v698_v16 = vmul.f32 %v323_v45, %v209_v60  ;;  %v514_v3 = vld [vmem:[%s912_s4 + $0x58] sm:$0xff] }
  0xaa   :  { %v700_v35 = vmul.f32 %v324_v8, %v210_v62  ;;  %v702_v42 = vmul.f32 %v325_v9, %v211_v63  ;;  %v290_v18 = vadd.f32 %v288_v17, %v278_v1  ;;  %v291_v25 = vadd.f32 %v288_v17, %v279_v12 }
  0xab   :  { %v292_v26 = vadd.f32 %v288_v17, %v280_v14  ;;  %v293_v20 = vadd.f32 %v288_v17, %v281_v15  ;;  %v342_v27 = vmul.f32 %v330_v10, %v322_v7  ;;  %v343_v22 = vmul.f32 %v331_v49, %v323_v45  ;;  %v516_v14 = vld [vmem:[%s912_s4 + $0x68] sm:$0xff]  ;;  %v517_v15 = vld [vmem:[%s912_s4 + $0x70] sm:$0xff]  ;;  %v518_v17 = vld [vmem:[%s912_s4 + $0x78] sm:$0xff] }
  0xac   :  { %v344_v24 = vmul.f32 %v332_v11, %v324_v8  ;;  %v345_v29 = vmul.f32 %v333_v61, %v325_v9  ;;  %v305_v30 = vsub.f32 %v298_v5, %v290_v18  ;;  %v306_v31 = vsub.f32 %v302_v6, %v291_v25 }
  0xad   :  { %v307_v23 = vsub.f32 %v298_v5, %v292_v26  ;;  %v308_v32 = vsub.f32 %v302_v6, %v293_v20  ;;  %v704_v28 = vmul.f32 %v330_v10, %v108_v55  ;;  %v706_v33 = vmul.f32 %v331_v49, %v109_v56  ;;  %v515_v49 = vld [vmem:[%s912_s4 + $0x60] sm:$0xff] }
  0xae   :  { %v708_v34 = vmul.f32 %v332_v11, %v110_v57  ;;  %v710_v37 = vmul.f32 %v333_v61, %v111_v58  ;;  %v728_v19 = vmul.f32 %v678_v41, %v305_v30  ;;  %v731_v46 = vmul.f32 %v678_v41, %v306_v31  ;;  %v348_v41 = vld [vmem:[%s912_s4 + $0x10] sm:$0xff]  ;;  %v519_v30 = vld [vmem:[%s912_s4 + $0x80] sm:$0xff] }
  0xaf   :  { %v734_v47 = vmul.f32 %v676_v36, %v307_v23  ;;  %v737_v48 = vmul.f32 %v676_v36, %v308_v32  ;;  %v739_v21 = vmul.f32 %v208_v59, %v108_v55  ;;  %v741_v50 = vmul.f32 %v209_v60, %v109_v56  ;;  %v349_v36 = vld [vmem:[%s912_s4 + $0x18] sm:$0xff] }
  0xb0   :  { %v743_v51 = vmul.f32 %v210_v62, %v110_v57  ;;  %v745_v52 = vmul.f32 %v211_v63, %v111_v58  ;;  %v757_v54 = vsub.f32 1.0, %v728_v19  ;;  %v760_v55 = vsub.f32 1.0, %v731_v46  ;;  %v511_v58 = vld [vmem:[%s912_s4 + $0x40] sm:$0xff] }
  0xb1   :  { %v763_v56 = vsub.f32 1.0, %v734_v47  ;;  %v766_v57 = vsub.f32 1.0, %v737_v48  ;;  %v363_v59 = vmul.f32 %v507_v38, %v728_v19  ;;  %v364_v60 = vmul.f32 %v508_v39, %v731_v46  ;;  %v520_v39 = vld [vmem:[%s912_s4 + $0x88] sm:$0xff] }
  0xb2   :  { %v365_v62 = vmul.f32 %v509_v43, %v734_v47  ;;  %v366_v63 = vmul.f32 %v510_v44, %v737_v48  ;;  %v350_v4 = vmul.f32 %v346_v40, %v757_v54  ;;  %v351_v5 = vmul.f32 %v347_v53, %v760_v55  ;;  %v521_v40 = vld [vmem:[%s912_s4 + $0x90] sm:$0xff]  ;;  %v522_v43 = vld [vmem:[%s912_s4 + $0x98] sm:$0xff] }
  0xb3   :  { %v352_v6 = vmul.f32 %v348_v41, %v763_v56  ;;  %v353_v7 = vmul.f32 %v349_v36, %v766_v57  ;;  %v367_v45 = vmul.f32 %v363_v59, %v342_v27  ;;  %v368_v8 = vmul.f32 %v364_v60, %v343_v22 }
  0xb4   :  { %v369_v9 = vmul.f32 %v365_v62, %v344_v24  ;;  %v370_v10 = vmul.f32 %v366_v63, %v345_v29  ;;  %v354_v11 = vmul.f32 %v350_v4, %v342_v27  ;;  %v355_v61 = vmul.f32 %v351_v5, %v343_v22  ;;  %v523_v63 = vld [vmem:[%s912_s4 + $0xa0] sm:$0xff]  ;;  %v524_v5 = vld [vmem:[%s912_s4 + $0xa8] sm:$0xff] }
  0xb5   :  { %v356_v1 = vmul.f32 %v352_v6, %v344_v24  ;;  %v357_v12 = vmul.f32 %v353_v7, %v345_v29  ;;  %v384_v18 = vmul.f32 %v511_v58, %v757_v54  ;;  %v385_v25 = vmul.f32 %v512_v0, %v760_v55  ;;  %v525_v6 = vld [vmem:[%s912_s4 + $0xb0] sm:$0xff]  ;;  %v526_v7 = vld [vmem:[%s912_s4 + $0xb8] sm:$0xff] }
  0xb6   :  { %v386_v26 = vmul.f32 %v513_v2, %v763_v56  ;;  %v387_v20 = vmul.f32 %v514_v3, %v766_v57  ;;  %v371_v27 = vadd.f32 %v367_v45, %v354_v11  ;;  %v372_v22 = vadd.f32 %v368_v8, %v355_v61 }
  0xb7   :  { %v373_v24 = vadd.f32 %v369_v9, %v356_v1  ;;  %v374_v29 = vadd.f32 %v370_v10, %v357_v12  ;;  %v388_v31 = vmul.f32 %v384_v18, %v696_v13  ;;  %v389_v23 = vmul.f32 %v385_v25, %v698_v16 }
  0xb8   :  { %v390_v32 = vmul.f32 %v386_v26, %v700_v35  ;;  %v391_v38 = vmul.f32 %v387_v20, %v702_v42  ;;  %v401_v44 = vmul.f32 %v515_v49, %v728_v19  ;;  %v402_v53 = vmul.f32 %v516_v14, %v731_v46  ;;  %v527_v49 = vld [vmem:[%s912_s4 + $0xc0] sm:$0xff]  ;;  %v528_v14 = vld [vmem:[%s912_s4 + $0xc8] sm:$0xff] }
  0xb9   :  { %v403_v41 = vmul.f32 %v517_v15, %v734_v47  ;;  %v404_v36 = vmul.f32 %v518_v17, %v737_v48  ;;  %v392_v58 = vadd.f32 %v388_v31, %v371_v27  ;;  %v393_v59 = vadd.f32 %v389_v23, %v372_v22  ;;  %v529_v15 = vld [vmem:[%s912_s4 + $0xd0] sm:$0xff]  ;;  %v530_v17 = vld [vmem:[%s912_s4 + $0xd8] sm:$0xff] }
  0xba   :  { %v394_v60 = vadd.f32 %v390_v32, %v373_v24  ;;  %v395_v62 = vadd.f32 %v391_v38, %v374_v29  ;;  %v405_v0 = vmul.f32 %v401_v44, %v696_v13  ;;  %v406_v2 = vmul.f32 %v402_v53, %v698_v16 }
  0xbb   :  { %v407_v3 = vmul.f32 %v403_v41, %v700_v35  ;;  %v408_v4 = vmul.f32 %v404_v36, %v702_v42  ;;  %v422_v13 = vmul.f32 %v519_v30, %v757_v54  ;;  %v423_v16 = vmul.f32 %v520_v39, %v760_v55  ;;  %v531_v30 = vld [vmem:[%s912_s4 + $0xe0] sm:$0xff]  ;;  %v532_v39 = vld [vmem:[%s912_s4 + $0xe8] sm:$0xff] }
  0xbc   :  { %v424_v35 = vmul.f32 %v521_v40, %v763_v56  ;;  %v425_v42 = vmul.f32 %v522_v43, %v766_v57  ;;  %v409_v45 = vadd.f32 %v405_v0, %v392_v58  ;;  %v410_v8 = vadd.f32 %v406_v2, %v393_v59  ;;  %v533_v40 = vld [vmem:[%s912_s4 + $0xf0] sm:$0xff]  ;;  %v534_v43 = vld [vmem:[%s912_s4 + $0xf8] sm:$0xff] }
  0xbd   :  { %v411_v9 = vadd.f32 %v407_v3, %v394_v60  ;;  %v412_v10 = vadd.f32 %v408_v4, %v395_v62  ;;  %v426_v11 = vmul.f32 %v422_v13, %v704_v28  ;;  %v427_v61 = vmul.f32 %v423_v16, %v706_v33 }
  0xbe   :  { %v428_v1 = vmul.f32 %v424_v35, %v708_v34  ;;  %v429_v12 = vmul.f32 %v425_v42, %v710_v37  ;;  %v439_v18 = vmul.f32 %v523_v63, %v728_v19  ;;  %v440_v25 = vmul.f32 %v524_v5, %v731_v46 }
  0xbf   :  { %v441_v26 = vmul.f32 %v525_v6, %v734_v47  ;;  %v442_v20 = vmul.f32 %v526_v7, %v737_v48  ;;  %v430_v27 = vadd.f32 %v426_v11, %v409_v45  ;;  %v431_v22 = vadd.f32 %v427_v61, %v410_v8 }
  0xc0   :  { %v432_v24 = vadd.f32 %v428_v1, %v411_v9  ;;  %v433_v29 = vadd.f32 %v429_v12, %v412_v10  ;;  %v443_v31 = vmul.f32 %v439_v18, %v704_v28  ;;  %v444_v23 = vmul.f32 %v440_v25, %v706_v33 }
  0xc1   :  { %v445_v32 = vmul.f32 %v441_v26, %v708_v34  ;;  %v446_v38 = vmul.f32 %v442_v20, %v710_v37  ;;  %v460_v28 = vmul.f32 %v527_v49, %v757_v54  ;;  %v461_v33 = vmul.f32 %v528_v14, %v760_v55 }
  0xc2   :  { %v462_v34 = vmul.f32 %v529_v15, %v763_v56  ;;  %v463_v37 = vmul.f32 %v530_v17, %v766_v57  ;;  %v447_v44 = vadd.f32 %v443_v31, %v430_v27  ;;  %v448_v53 = vadd.f32 %v444_v23, %v431_v22 }
  0xc3   :  { %v449_v41 = vadd.f32 %v445_v32, %v432_v24  ;;  %v450_v36 = vadd.f32 %v446_v38, %v433_v29  ;;  %v464_v58 = vmul.f32 %v460_v28, %v739_v21  ;;  %v465_v59 = vmul.f32 %v461_v33, %v741_v50 }
  0xc4   :  { %v466_v60 = vmul.f32 %v462_v34, %v743_v51  ;;  %v467_v62 = vmul.f32 %v463_v37, %v745_v52  ;;  %v477_v54 = vmul.f32 %v531_v30, %v728_v19  ;;  %v478_v55 = vmul.f32 %v532_v39, %v731_v46 }
  0xc5   :  { %v479_v56 = vmul.f32 %v533_v40, %v734_v47  ;;  %v480_v57 = vmul.f32 %v534_v43, %v737_v48  ;;  %v468_v63 = vadd.f32 %v464_v58, %v447_v44  ;;  %v469_v0 = vadd.f32 %v465_v59, %v448_v53 }
  0xc6   :  { %v470_v2 = vadd.f32 %v466_v60, %v449_v41  ;;  %v471_v3 = vadd.f32 %v467_v62, %v450_v36  ;;  %v481_v4 = vmul.f32 %v477_v54, %v739_v21  ;;  %v482_v5 = vmul.f32 %v478_v55, %v741_v50 }
  0xc7   :  { %v483_v6 = vmul.f32 %v479_v56, %v743_v51  ;;  %v484_v7 = vmul.f32 %v480_v57, %v745_v52 }
  0xc8   :  { %v485_v13 = vadd.f32 %v481_v4, %v468_v63  ;;  %v486_v19 = vadd.f32 %v482_v5, %v469_v0 }
  0xc9   :  { %v487_v16 = vadd.f32 %v483_v6, %v470_v2  ;;  %v488_v46 = vadd.f32 %v484_v7, %v471_v3 }
  0xca   :  { %489 = vst [vmem:[%s913_s5] sm:$0xff] %v485_v13  ;;  %490 = vst [vmem:[%s913_s5 + $0x8] sm:$0xff] %v486_v19 }
  0xcb   :  { %491 = vst [vmem:[%s913_s5 + $0x10] sm:$0xff] %v487_v16  ;;  %492 = vst [vmem:[%s913_s5 + $0x18] sm:$0xff] %v488_v46 }

</bundles_post_ra>
